<compile_context>
chip_gen: v6e
topology: v6e:2x2x1
jax: 0.10.0
libtpu: 0.0.40
codegen_flags: <defaults>
</compile_context>

<pallas_src>
import functools

import jax
import jax.numpy as jnp
from jax import lax
from jax.experimental import pallas as pl
from jax.experimental.pallas import tpu as pltpu


def _mappo_kernel(obs_ref, wfc_ref, bfc_ref, wih_ref, whh_ref, b_ref,
                  wout_ref, bout_ref, h0_ref, c0_ref,
                  out_ref, hn_ref, cn_ref,
                  xseq_ref, gx_ref,
                  *, Bc, T, H, L, gate_dtype):
    l = pl.program_id(1)

    # ---- fc + relu for this batch chunk: one (T*Bc, Do) @ (Do, H) MXU matmul.
    @pl.when(l == 0)
    def _():
        x = jnp.dot(obs_ref[...], wfc_ref[...],
                    preferred_element_type=jnp.float32)
        xseq_ref[...] = jnp.maximum(x + bfc_ref[...], 0.0)        # (T*Bc, H) f32

    # ---- hoisted input-to-hidden projection for the whole sequence ----------
    # One big MXU matmul at M = T*Bc, off the serial critical path.
    gx = jnp.dot(xseq_ref[...].astype(jnp.bfloat16), wih_ref[...],
                 preferred_element_type=jnp.float32) + b_ref[...]
    gx_ref[...] = gx.astype(gx_ref.dtype)                         # (T*Bc, 4H)

    whh = whh_ref[...]                                            # (H, 4H) bf16

    def step(t, carry):
        h, c = carry                                              # f32 (Bc, H)
        row = pl.multiple_of(t * Bc, Bc)
        # Only the recurrent matmul remains inside the serial chain.
        rec = jnp.dot(h.astype(jnp.bfloat16), whh,
                      preferred_element_type=jnp.float32)
        gates = (gx_ref[pl.ds(row, Bc), :].astype(jnp.float32) + rec
                 ).astype(gate_dtype)
        # Gate order after wrapper permutation: (i, f, o, g).
        # sigmoid(x) = 0.5*tanh(0.5*x) + 0.5 : one fused EUP slab for i|f|o.
        ifo = 0.5 * jnp.tanh(0.5 * gates[:, 0:3 * H]) + 0.5
        i = ifo[:, 0:H]
        f = ifo[:, H:2 * H]
        o = ifo[:, 2 * H:3 * H]
        g = jnp.tanh(gates[:, 3 * H:4 * H])
        c_new = f * c + i * g                                     # promotes to f32
        h_new = o * jnp.tanh(c_new)                               # f32
        # Overwrite this layer's input slot with its output (feeds layer l+1).
        xseq_ref[pl.ds(row, Bc), :] = h_new
        return (h_new, c_new)

    unroll = True if T <= 16 else 8
    h_last, c_last = lax.fori_loop(0, T, step, (h0_ref[...], c0_ref[...]),
                                   unroll=unroll)
    hn_ref[...] = h_last
    cn_ref[...] = c_last

    # ---- output projection (lane-dense, padded to a multiple of 128) --------
    @pl.when(l == L - 1)
    def _():
        out_ref[...] = (jnp.dot(xseq_ref[...].astype(jnp.bfloat16),
                                wout_ref[...],
                                preferred_element_type=jnp.float32)
                        + bout_ref[...])


def mappo_policy_rnn_forward(obs, params, hidden=None, *,
                             batch_chunk=None, gates_bf16=None):
    """obs: (B, T, obs_dim) f32.  hidden: optional (h_0, c_0), each (L, B, H).

    Returns (out (B, T, A), (h_n, c_n)), matching the PyTorch module."""
    B, T, Do = obs.shape
    H = params["w_fc"].shape[1]
    L = params["w_ih"].shape[0]
    A = params["w_out"].shape[1]
    A_pad = pl.cdiv(A, 128) * 128

    assert B % 8 == 0, "batch must be a multiple of 8 (sublane alignment)"
    assert H % 128 == 0, "hidden_dim must be a multiple of 128 (lane alignment)"

    if batch_chunk is None:
        # Split the batch in two for v7x megacore when it stays sublane-aligned.
        batch_chunk = B // 2 if (B >= 16 and (B // 2) % 8 == 0) else B
    Bc = batch_chunk
    assert B % Bc == 0 and Bc % 8 == 0
    nb = B // Bc

    if gates_bf16 is None:
        kind = jax.devices()[0].device_kind.lower()
        # bf16 VPU/EUP only on v6e / v7x; keep gate math f32 elsewhere (v5e...).
        gates_bf16 = ("v6" in kind) or ("v7" in kind)
    gate_dtype = jnp.bfloat16 if gates_bf16 else jnp.float32
    # bf16 gx halves the largest scratch; needs packed-sublane (16-row) aligned
    # per-step slices, i.e. Bc % 16 == 0.
    gx_dtype = jnp.bfloat16 if Bc % 16 == 0 else jnp.float32

    # ---- weight prep (once, outside the kernel) ------------------------------
    def permute_gates(w):  # last axis is 4H in (i,f,g,o) -> reorder to (i,f,o,g)
        return jnp.concatenate(
            [w[..., :2 * H], w[..., 3 * H:4 * H], w[..., 2 * H:3 * H]], axis=-1)

    w_fc = params["w_fc"].astype(jnp.bfloat16)
    b_fc = params["b_fc"].astype(jnp.float32)
    w_ih = permute_gates(params["w_ih"]).astype(jnp.bfloat16)
    w_hh = permute_gates(params["w_hh"]).astype(jnp.bfloat16)
    b_ls = permute_gates(params["b_lstm"]).astype(jnp.float32)
    w_out = jnp.pad(params["w_out"], ((0, 0), (0, A_pad - A))).astype(jnp.bfloat16)
    b_out = jnp.pad(params["b_out"], ((0, 0), (0, A_pad - A))).astype(jnp.float32)

    # ---- activations: time-major, batch-chunked ------------------------------
    # chunk c holds global batch rows [c*Bc, (c+1)*Bc); row within chunk = t*Bc + b.
    obs_c = (obs.astype(jnp.bfloat16)
             .transpose(1, 0, 2)                  # (T, B, Do)
             .reshape(T, nb, Bc, Do)
             .transpose(1, 0, 2, 3)               # (nb, T, Bc, Do)
             .reshape(nb, T * Bc, Do))

    if hidden is None:
        h0 = jnp.zeros((L, B, H), jnp.float32)
        c0 = jnp.zeros((L, B, H), jnp.float32)
    else:
        h0, c0 = hidden
        h0 = h0.astype(jnp.float32)
        c0 = c0.astype(jnp.float32)
    h0_c = h0.reshape(L, nb, Bc, H)
    c0_c = c0.reshape(L, nb, Bc, H)

    # ---- VMEM footprint estimate -> compiler limit ---------------------------
    def _nbytes(shape, dt):
        n = 1
        for s in shape:
            n *= s
        return n * jnp.dtype(dt).itemsize

    blocks = [
        ((T * Bc, Do), jnp.bfloat16),                              # obs chunk
        ((Do, H), jnp.bfloat16), ((1, H), jnp.float32),            # fc
        ((H, 4 * H), jnp.bfloat16), ((H, 4 * H), jnp.bfloat16),    # w_ih, w_hh
        ((1, 4 * H), jnp.float32),                                 # b_lstm
        ((H, A_pad), jnp.bfloat16), ((1, A_pad), jnp.float32),     # out proj
        ((Bc, H), jnp.float32), ((Bc, H), jnp.float32),            # h0, c0
        ((T * Bc, A_pad), jnp.float32),                            # out block
        ((Bc, H), jnp.float32), ((Bc, H), jnp.float32),            # hn, cn
    ]
    scratch_bytes = (_nbytes((T * Bc, H), jnp.float32)
                     + _nbytes((T * Bc, 4 * H), gx_dtype))
    est = 2 * sum(_nbytes(s, d) for s, d in blocks) + scratch_bytes
    vmem_limit = int(min(max(est * 5 // 4, 32 * 1024 * 1024), 100 * 1024 * 1024))

    kernel = functools.partial(_mappo_kernel, Bc=Bc, T=T, H=H, L=L,
                               gate_dtype=gate_dtype)

    out_c, hn_c, cn_c = pl.pallas_call(
        kernel,
        grid=(nb, L),
        out_shape=(
            jax.ShapeDtypeStruct((nb, T * Bc, A_pad), jnp.float32),
            jax.ShapeDtypeStruct((L, nb, Bc, H), jnp.float32),
            jax.ShapeDtypeStruct((L, nb, Bc, H), jnp.float32),
        ),
        in_specs=[
            pl.BlockSpec((None, T * Bc, Do), lambda b, l: (b, 0, 0)),    # obs
            pl.BlockSpec((Do, H), lambda b, l: (0, 0)),                  # w_fc
            pl.BlockSpec((1, H), lambda b, l: (0, 0)),                   # b_fc
            pl.BlockSpec((None, H, 4 * H), lambda b, l: (l, 0, 0)),      # w_ih[l]
            pl.BlockSpec((None, H, 4 * H), lambda b, l: (l, 0, 0)),      # w_hh[l]
            pl.BlockSpec((None, 1, 4 * H), lambda b, l: (l, 0, 0)),      # b_lstm[l]
            pl.BlockSpec((H, A_pad), lambda b, l: (0, 0)),               # w_out
            pl.BlockSpec((1, A_pad), lambda b, l: (0, 0)),               # b_out
            pl.BlockSpec((None, None, Bc, H), lambda b, l: (l, b, 0, 0)),  # h_0
            pl.BlockSpec((None, None, Bc, H), lambda b, l: (l, b, 0, 0)),  # c_0
        ],
        out_specs=(
            pl.BlockSpec((None, T * Bc, A_pad), lambda b, l: (b, 0, 0)),
            pl.BlockSpec((None, None, Bc, H), lambda b, l: (l, b, 0, 0)),
            pl.BlockSpec((None, None, Bc, H), lambda b, l: (l, b, 0, 0)),
        ),
        scratch_shapes=[
            pltpu.VMEM((T * Bc, H), jnp.float32),     # layer activations (xseq)
            pltpu.VMEM((T * Bc, 4 * H), gx_dtype),    # hoisted x@W_ih + b
        ],
        compiler_params=pltpu.CompilerParams(
            dimension_semantics=("parallel", "arbitrary"),
            vmem_limit_bytes=vmem_limit,
        ),
    )(obs_c, w_fc, b_fc, w_ih, w_hh, b_ls, w_out, b_out, h0_c, c0_c)

    out = (out_c[:, :, :A]
           .reshape(nb, T, Bc, A)
           .transpose(0, 2, 1, 3)
           .reshape(B, T, A))
    h_n = hn_c.reshape(L, B, H)
    c_n = cn_c.reshape(L, B, H)
    return out, (h_n, c_n)


def _ref_forward(obs, params, hidden=None):
    """Pure-JAX f32 reference with PyTorch-module semantics (for validation)."""
    B, T, _ = obs.shape
    H = params["w_fc"].shape[1]
    L = params["w_ih"].shape[0]
    x = jax.nn.relu(obs @ params["w_fc"] + params["b_fc"])           # (B, T, H)
    if hidden is None:
        h0 = jnp.zeros((L, B, H), jnp.float32)
        c0 = jnp.zeros((L, B, H), jnp.float32)
    else:
        h0, c0 = hidden
    hs, cs = [], []
    inp = x
    for l in range(L):
        h, c = h0[l], c0[l]
        outs = []
        for t in range(T):
            g = (inp[:, t, :] @ params["w_ih"][l]
                 + h @ params["w_hh"][l] + params["b_lstm"][l])
            i = jax.nn.sigmoid(g[:, 0 * H:1 * H])
            f = jax.nn.sigmoid(g[:, 1 * H:2 * H])
            gg = jnp.tanh(g[:, 2 * H:3 * H])
            o = jax.nn.sigmoid(g[:, 3 * H:4 * H])
            c = f * c + i * gg
            h = o * jnp.tanh(c)
            outs.append(h)
        inp = jnp.stack(outs, axis=1)
        hs.append(h)
        cs.append(c)
    out = inp @ params["w_out"] + params["b_out"]
    return out, (jnp.stack(hs), jnp.stack(cs))


def init_params(key, obs_dim, n_actions, hidden_dim, n_layers):
    ks = jax.random.split(key, 8)
    s = 0.1
    return {
        "w_fc":   s * jax.random.normal(ks[0], (obs_dim, hidden_dim), jnp.float32),
        "b_fc":   s * jax.random.normal(ks[1], (1, hidden_dim), jnp.float32),
        "w_ih":   s * jax.random.normal(ks[2], (n_layers, hidden_dim, 4 * hidden_dim), jnp.float32),
        "w_hh":   s * jax.random.normal(ks[3], (n_layers, hidden_dim, 4 * hidden_dim), jnp.float32),
        # combined bias = b_ih + b_hh (PyTorch has two; only their sum matters)
        "b_lstm": s * jax.random.normal(ks[4], (n_layers, 1, 4 * hidden_dim), jnp.float32),
        "w_out":  s * jax.random.normal(ks[5], (hidden_dim, n_actions), jnp.float32),
        "b_out":  s * jax.random.normal(ks[6], (1, n_actions), jnp.float32),
    }


if __name__ == "__main__":
    # Small shapes consistent with the module (hidden_dim / n_layers scaled down).
    B, T = 8, 8
    OBS_DIM, N_ACTIONS, HIDDEN_DIM, N_LAYERS = 64, 16, 128, 2

    key = jax.random.PRNGKey(0)
    k_obs, k_par, k_h, k_c = jax.random.split(key, 4)
    obs = jax.random.normal(k_obs, (B, T, OBS_DIM), jnp.float32)
    params = init_params(k_par, OBS_DIM, N_ACTIONS, HIDDEN_DIM, N_LAYERS)
    hidden = (0.1 * jax.random.normal(k_h, (N_LAYERS, B, HIDDEN_DIM), jnp.float32),
              0.1 * jax.random.normal(k_c, (N_LAYERS, B, HIDDEN_DIM), jnp.float32))

    # Test both the default (hidden=None -> zeros) and a user-supplied hidden.
    for hid in (None, hidden):
        out, (h_n, c_n) = mappo_policy_rnn_forward(obs, params, hid)
        jax.block_until_ready((out, h_n, c_n))

        out_r, (h_r, c_r) = _ref_forward(obs, params, hid)
        assert out.shape == (B, T, N_ACTIONS)
        assert h_n.shape == (N_LAYERS, B, HIDDEN_DIM)
        assert c_n.shape == (N_LAYERS, B, HIDDEN_DIM)
        # bf16 MXU inputs (+ bf16 gate math on v6e/v7x) -> loosened tolerance
        # vs. the f32 reference.
        assert jnp.allclose(out, out_r, atol=5e-2, rtol=5e-2)
        assert jnp.allclose(h_n, h_r, atol=5e-2, rtol=5e-2)
        assert jnp.allclose(c_n, c_r, atol=5e-2, rtol=5e-2)

    print("KERNEL_OK")
</pallas_src>

<mosaic_0001>
module attributes {stable_mosaic.version = 11 : i64} {
  func.func @_mappo_kernel(%arg0: i32, %arg1: i32, %arg2: memref<1x64x64xbf16, #tpu.memory_space<vmem>>, %arg3: memref<64x128xbf16, #tpu.memory_space<vmem>>, %arg4: memref<1x128xf32, #tpu.memory_space<vmem>>, %arg5: memref<1x128x512xbf16, #tpu.memory_space<vmem>>, %arg6: memref<1x128x512xbf16, #tpu.memory_space<vmem>>, %arg7: memref<1x1x512xf32, #tpu.memory_space<vmem>>, %arg8: memref<128x128xbf16, #tpu.memory_space<vmem>>, %arg9: memref<1x128xf32, #tpu.memory_space<vmem>>, %arg10: memref<1x1x8x128xf32, #tpu.memory_space<vmem>>, %arg11: memref<1x1x8x128xf32, #tpu.memory_space<vmem>>, %arg12: memref<1x64x128xf32, #tpu.memory_space<vmem>>, %arg13: memref<1x1x8x128xf32, #tpu.memory_space<vmem>>, %arg14: memref<1x1x8x128xf32, #tpu.memory_space<vmem>>, %arg15: memref<64x128xf32, #tpu.memory_space<vmem>>, %arg16: memref<64x512xf32, #tpu.memory_space<vmem>>) attributes {dimension_semantics = [#tpu.dimension_semantics<parallel>, #tpu.dimension_semantics<arbitrary>], iteration_bounds = array<i64: 1, 2>, scalar_prefetch = 0 : i64, scratch_operands = 2 : i64, tpu.core_type = #tpu.core_type<tc>, window_params = [{transform_indices = @transform_0, window_bounds = array<i64: 1, 64, 64>}, {pipeline_mode = #tpu.pipeline_mode<synchronous>, transform_indices = @transform_1, window_bounds = array<i64: 64, 128>}, {pipeline_mode = #tpu.pipeline_mode<synchronous>, transform_indices = @transform_2, window_bounds = array<i64: 1, 128>}, {transform_indices = @transform_3, window_bounds = array<i64: 1, 128, 512>}, {transform_indices = @transform_4, window_bounds = array<i64: 1, 128, 512>}, {transform_indices = @transform_5, window_bounds = array<i64: 1, 1, 512>}, {pipeline_mode = #tpu.pipeline_mode<synchronous>, transform_indices = @transform_6, window_bounds = array<i64: 128, 128>}, {pipeline_mode = #tpu.pipeline_mode<synchronous>, transform_indices = @transform_7, window_bounds = array<i64: 1, 128>}, {transform_indices = @transform_8, window_bounds = array<i64: 1, 1, 8, 128>}, {transform_indices = @transform_9, window_bounds = array<i64: 1, 1, 8, 128>}, {transform_indices = @transform_10, window_bounds = array<i64: 1, 64, 128>}, {transform_indices = @transform_11, window_bounds = array<i64: 1, 1, 8, 128>}, {transform_indices = @transform_12, window_bounds = array<i64: 1, 1, 8, 128>}]} {
    %c0_i32 = arith.constant 0 : i32
    %0 = arith.cmpi eq, %arg1, %c0_i32 : i32
    %1 = arith.extui %0 : i1 to i32
    %c0_i32_0 = arith.constant 0 : i32
    %2 = arith.cmpi ne, %1, %c0_i32_0 : i32
    scf.if %2 {
      %c0_88 = arith.constant 0 : index
      %c0_89 = arith.constant 0 : index
      %c0_90 = arith.constant 0 : index
      %244 = vector.load %arg2[%c0_88, %c0_89, %c0_90] : memref<1x64x64xbf16, #tpu.memory_space<vmem>>, vector<1x64x64xbf16>
      %245 = vector.shape_cast %244 : vector<1x64x64xbf16> to vector<64x64xbf16>
      %c0_91 = arith.constant 0 : index
      %c0_92 = arith.constant 0 : index
      %246 = vector.load %arg3[%c0_91, %c0_92] : memref<64x128xbf16, #tpu.memory_space<vmem>>, vector<64x128xbf16>
      %cst_93 = arith.constant dense<0.000000e+00> : vector<64x128xf32>
      %247 = tpu.matmul %245, %246, %cst_93 {dimension_numbers = #tpu.dot_dimension_numbers<[1], [0], [0], [1], [0, 0, 1, 1], [], []>} : vector<64x64xbf16>, vector<64x128xbf16>, vector<64x128xf32> -> vector<64x128xf32>
      %c0_94 = arith.constant 0 : index
      %c0_95 = arith.constant 0 : index
      %248 = vector.load %arg4[%c0_94, %c0_95] : memref<1x128xf32, #tpu.memory_space<vmem>>, vector<1x128xf32>
      %249 = vector.broadcast %248 : vector<1x128xf32> to vector<64x128xf32>
      %250 = arith.addf %247, %249 : vector<64x128xf32>
      %cst_96 = arith.constant 0.000000e+00 : f32
      %251 = vector.broadcast %cst_96 : f32 to vector<64x128xf32>
      %252 = arith.maximumf %250, %251 : vector<64x128xf32>
      %c0_97 = arith.constant 0 : index
      %c0_98 = arith.constant 0 : index
      %253 = vector.load %arg15[%c0_97, %c0_98] : memref<64x128xf32, #tpu.memory_space<vmem>>, vector<64x128xf32>
      tpu.vector_store %arg15[%c0_97, %c0_98], %252 {strides = array<i32>} : memref<64x128xf32, #tpu.memory_space<vmem>>, vector<64x128xf32>,
    } else {
    }
    %c0 = arith.constant 0 : index
    %c0_1 = arith.constant 0 : index
    %3 = vector.load %arg15[%c0, %c0_1] : memref<64x128xf32, #tpu.memory_space<vmem>>, vector<64x128xf32>
    %4 = arith.truncf %3 : vector<64x128xf32> to vector<64x128xbf16>
    %c0_2 = arith.constant 0 : index
    %c0_3 = arith.constant 0 : index
    %c0_4 = arith.constant 0 : index
    %5 = vector.load %arg5[%c0_2, %c0_3, %c0_4] : memref<1x128x512xbf16, #tpu.memory_space<vmem>>, vector<1x128x512xbf16>
    %6 = vector.shape_cast %5 : vector<1x128x512xbf16> to vector<128x512xbf16>
    %cst = arith.constant dense<0.000000e+00> : vector<64x512xf32>
    %7 = tpu.matmul %4, %6, %cst {dimension_numbers = #tpu.dot_dimension_numbers<[1], [0], [0], [1], [0, 0, 1, 1], [], []>} : vector<64x128xbf16>, vector<128x512xbf16>, vector<64x512xf32> -> vector<64x512xf32>
    %c0_5 = arith.constant 0 : index
    %c0_6 = arith.constant 0 : index
    %c0_7 = arith.constant 0 : index
    %8 = vector.load %arg7[%c0_5, %c0_6, %c0_7] : memref<1x1x512xf32, #tpu.memory_space<vmem>>, vector<1x1x512xf32>
    %9 = vector.shape_cast %8 : vector<1x1x512xf32> to vector<1x512xf32>
    %10 = vector.broadcast %9 : vector<1x512xf32> to vector<64x512xf32>
    %11 = arith.addf %7, %10 : vector<64x512xf32>
    %c0_8 = arith.constant 0 : index
    %c0_9 = arith.constant 0 : index
    %12 = vector.load %arg16[%c0_8, %c0_9] : memref<64x512xf32, #tpu.memory_space<vmem>>, vector<64x512xf32>
    tpu.vector_store %arg16[%c0_8, %c0_9], %11 {strides = array<i32>} : memref<64x512xf32, #tpu.memory_space<vmem>>, vector<64x512xf32>,
    %c0_10 = arith.constant 0 : index
    %c0_11 = arith.constant 0 : index
    %c0_12 = arith.constant 0 : index
    %13 = vector.load %arg6[%c0_10, %c0_11, %c0_12] : memref<1x128x512xbf16, #tpu.memory_space<vmem>>, vector<1x128x512xbf16>
    %14 = vector.shape_cast %13 : vector<1x128x512xbf16> to vector<128x512xbf16>
    %c0_13 = arith.constant 0 : index
    %c0_14 = arith.constant 0 : index
    %c0_15 = arith.constant 0 : index
    %c0_16 = arith.constant 0 : index
    %15 = vector.load %arg10[%c0_13, %c0_14, %c0_15, %c0_16] : memref<1x1x8x128xf32, #tpu.memory_space<vmem>>, vector<1x1x8x128xf32>
    %16 = vector.shape_cast %15 : vector<1x1x8x128xf32> to vector<8x128xf32>
    %c0_17 = arith.constant 0 : index
    %c0_18 = arith.constant 0 : index
    %c0_19 = arith.constant 0 : index
    %c0_20 = arith.constant 0 : index
    %17 = vector.load %arg11[%c0_17, %c0_18, %c0_19, %c0_20] : memref<1x1x8x128xf32, #tpu.memory_space<vmem>>, vector<1x1x8x128xf32>
    %18 = vector.shape_cast %17 : vector<1x1x8x128xf32> to vector<8x128xf32>
    %c0_i32_21 = arith.constant 0 : i32
    %c8_i32 = arith.constant 8 : i32
    %19 = arith.muli %c0_i32_21, %c8_i32 : i32
    %20 = tpu.assume_multiple %19, 8 : i32
    %21 = arith.truncf %16 : vector<8x128xf32> to vector<8x128xbf16>
    %cst_22 = arith.constant dense<0.000000e+00> : vector<8x512xf32>
    %22 = tpu.matmul %21, %14, %cst_22 {dimension_numbers = #tpu.dot_dimension_numbers<[1], [0], [0], [1], [0, 0, 1, 1], [], []>} : vector<8x128xbf16>, vector<128x512xbf16>, vector<8x512xf32> -> vector<8x512xf32>
    %23 = arith.index_cast %20 : i32 to index
    %c0_23 = arith.constant 0 : index
    %24 = vector.load %arg16[%23, %c0_23] : memref<64x512xf32, #tpu.memory_space<vmem>>, vector<8x512xf32>
    %25 = arith.addf %24, %22 : vector<8x512xf32>
    %26 = vector.extract_strided_slice %25 {offsets = [0, 0], sizes = [8, 384], strides = [1, 1]} : vector<8x512xf32> to vector<8x384xf32>
    %cst_24 = arith.constant 5.000000e-01 : f32
    %27 = vector.broadcast %cst_24 : f32 to vector<8x384xf32>
    %28 = arith.mulf %27, %26 : vector<8x384xf32>
    %29 = math.tanh %28 : vector<8x384xf32>
    %cst_25 = arith.constant 5.000000e-01 : f32
    %30 = vector.broadcast %cst_25 : f32 to vector<8x384xf32>
    %31 = arith.mulf %30, %29 : vector<8x384xf32>
    %cst_26 = arith.constant 5.000000e-01 : f32
    %32 = vector.broadcast %cst_26 : f32 to vector<8x384xf32>
    %33 = arith.addf %31, %32 : vector<8x384xf32>
    %34 = vector.extract_strided_slice %33 {offsets = [0, 0], sizes = [8, 128], strides = [1, 1]} : vector<8x384xf32> to vector<8x128xf32>
    %35 = vector.extract_strided_slice %33 {offsets = [0, 128], sizes = [8, 128], strides = [1, 1]} : vector<8x384xf32> to vector<8x128xf32>
    %36 = vector.extract_strided_slice %33 {offsets = [0, 256], sizes = [8, 128], strides = [1, 1]} : vector<8x384xf32> to vector<8x128xf32>
    %37 = vector.extract_strided_slice %25 {offsets = [0, 384], sizes = [8, 128], strides = [1, 1]} : vector<8x512xf32> to vector<8x128xf32>
    %38 = math.tanh %37 : vector<8x128xf32>
    %39 = arith.mulf %35, %18 : vector<8x128xf32>
    %40 = arith.mulf %34, %38 : vector<8x128xf32>
    %41 = arith.addf %39, %40 : vector<8x128xf32>
    %42 = math.tanh %41 : vector<8x128xf32>
    %43 = arith.mulf %36, %42 : vector<8x128xf32>
    %44 = arith.index_cast %20 : i32 to index
    %c0_27 = arith.constant 0 : index
    %45 = vector.load %arg15[%44, %c0_27] : memref<64x128xf32, #tpu.memory_space<vmem>>, vector<8x128xf32>
    tpu.vector_store %arg15[%44, %c0_27], %43 {strides = array<i32>} : memref<64x128xf32, #tpu.memory_space<vmem>>, vector<8x128xf32>,
    %c1_i32 = arith.constant 1 : i32
    %c8_i32_28 = arith.constant 8 : i32
    %46 = arith.muli %c1_i32, %c8_i32_28 : i32
    %47 = tpu.assume_multiple %46, 8 : i32
    %48 = arith.truncf %43 : vector<8x128xf32> to vector<8x128xbf16>
    %cst_29 = arith.constant dense<0.000000e+00> : vector<8x512xf32>
    %49 = tpu.matmul %48, %14, %cst_29 {dimension_numbers = #tpu.dot_dimension_numbers<[1], [0], [0], [1], [0, 0, 1, 1], [], []>} : vector<8x128xbf16>, vector<128x512xbf16>, vector<8x512xf32> -> vector<8x512xf32>
    %50 = arith.index_cast %47 : i32 to index
    %c0_30 = arith.constant 0 : index
    %51 = vector.load %arg16[%50, %c0_30] : memref<64x512xf32, #tpu.memory_space<vmem>>, vector<8x512xf32>
    %52 = arith.addf %51, %49 : vector<8x512xf32>
    %53 = vector.extract_strided_slice %52 {offsets = [0, 0], sizes = [8, 384], strides = [1, 1]} : vector<8x512xf32> to vector<8x384xf32>
    %cst_31 = arith.constant 5.000000e-01 : f32
    %54 = vector.broadcast %cst_31 : f32 to vector<8x384xf32>
    %55 = arith.mulf %54, %53 : vector<8x384xf32>
    %56 = math.tanh %55 : vector<8x384xf32>
    %cst_32 = arith.constant 5.000000e-01 : f32
    %57 = vector.broadcast %cst_32 : f32 to vector<8x384xf32>
    %58 = arith.mulf %57, %56 : vector<8x384xf32>
    %cst_33 = arith.constant 5.000000e-01 : f32
    %59 = vector.broadcast %cst_33 : f32 to vector<8x384xf32>
    %60 = arith.addf %58, %59 : vector<8x384xf32>
    %61 = vector.extract_strided_slice %60 {offsets = [0, 0], sizes = [8, 128], strides = [1, 1]} : vector<8x384xf32> to vector<8x128xf32>
    %62 = vector.extract_strided_slice %60 {offsets = [0, 128], sizes = [8, 128], strides = [1, 1]} : vector<8x384xf32> to vector<8x128xf32>
    %63 = vector.extract_strided_slice %60 {offsets = [0, 256], sizes = [8, 128], strides = [1, 1]} : vector<8x384xf32> to vector<8x128xf32>
    %64 = vector.extract_strided_slice %52 {offsets = [0, 384], sizes = [8, 128], strides = [1, 1]} : vector<8x512xf32> to vector<8x128xf32>
    %65 = math.tanh %64 : vector<8x128xf32>
    %66 = arith.mulf %62, %41 : vector<8x128xf32>
    %67 = arith.mulf %61, %65 : vector<8x128xf32>
    %68 = arith.addf %66, %67 : vector<8x128xf32>
    %69 = math.tanh %68 : vector<8x128xf32>
    %70 = arith.mulf %63, %69 : vector<8x128xf32>
    %71 = arith.index_cast %47 : i32 to index
    %c0_34 = arith.constant 0 : index
    %72 = vector.load %arg15[%71, %c0_34] : memref<64x128xf32, #tpu.memory_space<vmem>>, vector<8x128xf32>
    tpu.vector_store %arg15[%71, %c0_34], %70 {strides = array<i32>} : memref<64x128xf32, #tpu.memory_space<vmem>>, vector<8x128xf32>,
    %c2_i32 = arith.constant 2 : i32
    %c8_i32_35 = arith.constant 8 : i32
    %73 = arith.muli %c2_i32, %c8_i32_35 : i32
    %74 = tpu.assume_multiple %73, 8 : i32
    %75 = arith.truncf %70 : vector<8x128xf32> to vector<8x128xbf16>
    %cst_36 = arith.constant dense<0.000000e+00> : vector<8x512xf32>
    %76 = tpu.matmul %75, %14, %cst_36 {dimension_numbers = #tpu.dot_dimension_numbers<[1], [0], [0], [1], [0, 0, 1, 1], [], []>} : vector<8x128xbf16>, vector<128x512xbf16>, vector<8x512xf32> -> vector<8x512xf32>
    %77 = arith.index_cast %74 : i32 to index
    %c0_37 = arith.constant 0 : index
    %78 = vector.load %arg16[%77, %c0_37] : memref<64x512xf32, #tpu.memory_space<vmem>>, vector<8x512xf32>
    %79 = arith.addf %78, %76 : vector<8x512xf32>
    %80 = vector.extract_strided_slice %79 {offsets = [0, 0], sizes = [8, 384], strides = [1, 1]} : vector<8x512xf32> to vector<8x384xf32>
    %cst_38 = arith.constant 5.000000e-01 : f32
    %81 = vector.broadcast %cst_38 : f32 to vector<8x384xf32>
    %82 = arith.mulf %81, %80 : vector<8x384xf32>
    %83 = math.tanh %82 : vector<8x384xf32>
    %cst_39 = arith.constant 5.000000e-01 : f32
    %84 = vector.broadcast %cst_39 : f32 to vector<8x384xf32>
    %85 = arith.mulf %84, %83 : vector<8x384xf32>
    %cst_40 = arith.constant 5.000000e-01 : f32
    %86 = vector.broadcast %cst_40 : f32 to vector<8x384xf32>
    %87 = arith.addf %85, %86 : vector<8x384xf32>
    %88 = vector.extract_strided_slice %87 {offsets = [0, 0], sizes = [8, 128], strides = [1, 1]} : vector<8x384xf32> to vector<8x128xf32>
    %89 = vector.extract_strided_slice %87 {offsets = [0, 128], sizes = [8, 128], strides = [1, 1]} : vector<8x384xf32> to vector<8x128xf32>
    %90 = vector.extract_strided_slice %87 {offsets = [0, 256], sizes = [8, 128], strides = [1, 1]} : vector<8x384xf32> to vector<8x128xf32>
    %91 = vector.extract_strided_slice %79 {offsets = [0, 384], sizes = [8, 128], strides = [1, 1]} : vector<8x512xf32> to vector<8x128xf32>
    %92 = math.tanh %91 : vector<8x128xf32>
    %93 = arith.mulf %89, %68 : vector<8x128xf32>
    %94 = arith.mulf %88, %92 : vector<8x128xf32>
    %95 = arith.addf %93, %94 : vector<8x128xf32>
    %96 = math.tanh %95 : vector<8x128xf32>
    %97 = arith.mulf %90, %96 : vector<8x128xf32>
    %98 = arith.index_cast %74 : i32 to index
    %c0_41 = arith.constant 0 : index
    %99 = vector.load %arg15[%98, %c0_41] : memref<64x128xf32, #tpu.memory_space<vmem>>, vector<8x128xf32>
    tpu.vector_store %arg15[%98, %c0_41], %97 {strides = array<i32>} : memref<64x128xf32, #tpu.memory_space<vmem>>, vector<8x128xf32>,
    %c3_i32 = arith.constant 3 : i32
    %c8_i32_42 = arith.constant 8 : i32
    %100 = arith.muli %c3_i32, %c8_i32_42 : i32
    %101 = tpu.assume_multiple %100, 8 : i32
    %102 = arith.truncf %97 : vector<8x128xf32> to vector<8x128xbf16>
    %cst_43 = arith.constant dense<0.000000e+00> : vector<8x512xf32>
    %103 = tpu.matmul %102, %14, %cst_43 {dimension_numbers = #tpu.dot_dimension_numbers<[1], [0], [0], [1], [0, 0, 1, 1], [], []>} : vector<8x128xbf16>, vector<128x512xbf16>, vector<8x512xf32> -> vector<8x512xf32>
    %104 = arith.index_cast %101 : i32 to index
    %c0_44 = arith.constant 0 : index
    %105 = vector.load %arg16[%104, %c0_44] : memref<64x512xf32, #tpu.memory_space<vmem>>, vector<8x512xf32>
    %106 = arith.addf %105, %103 : vector<8x512xf32>
    %107 = vector.extract_strided_slice %106 {offsets = [0, 0], sizes = [8, 384], strides = [1, 1]} : vector<8x512xf32> to vector<8x384xf32>
    %cst_45 = arith.constant 5.000000e-01 : f32
    %108 = vector.broadcast %cst_45 : f32 to vector<8x384xf32>
    %109 = arith.mulf %108, %107 : vector<8x384xf32>
    %110 = math.tanh %109 : vector<8x384xf32>
    %cst_46 = arith.constant 5.000000e-01 : f32
    %111 = vector.broadcast %cst_46 : f32 to vector<8x384xf32>
    %112 = arith.mulf %111, %110 : vector<8x384xf32>
    %cst_47 = arith.constant 5.000000e-01 : f32
    %113 = vector.broadcast %cst_47 : f32 to vector<8x384xf32>
    %114 = arith.addf %112, %113 : vector<8x384xf32>
    %115 = vector.extract_strided_slice %114 {offsets = [0, 0], sizes = [8, 128], strides = [1, 1]} : vector<8x384xf32> to vector<8x128xf32>
    %116 = vector.extract_strided_slice %114 {offsets = [0, 128], sizes = [8, 128], strides = [1, 1]} : vector<8x384xf32> to vector<8x128xf32>
    %117 = vector.extract_strided_slice %114 {offsets = [0, 256], sizes = [8, 128], strides = [1, 1]} : vector<8x384xf32> to vector<8x128xf32>
    %118 = vector.extract_strided_slice %106 {offsets = [0, 384], sizes = [8, 128], strides = [1, 1]} : vector<8x512xf32> to vector<8x128xf32>
    %119 = math.tanh %118 : vector<8x128xf32>
    %120 = arith.mulf %116, %95 : vector<8x128xf32>
    %121 = arith.mulf %115, %119 : vector<8x128xf32>
    %122 = arith.addf %120, %121 : vector<8x128xf32>
    %123 = math.tanh %122 : vector<8x128xf32>
    %124 = arith.mulf %117, %123 : vector<8x128xf32>
    %125 = arith.index_cast %101 : i32 to index
    %c0_48 = arith.constant 0 : index
    %126 = vector.load %arg15[%125, %c0_48] : memref<64x128xf32, #tpu.memory_space<vmem>>, vector<8x128xf32>
    tpu.vector_store %arg15[%125, %c0_48], %124 {strides = array<i32>} : memref<64x128xf32, #tpu.memory_space<vmem>>, vector<8x128xf32>,
    %c4_i32 = arith.constant 4 : i32
    %c8_i32_49 = arith.constant 8 : i32
    %127 = arith.muli %c4_i32, %c8_i32_49 : i32
    %128 = tpu.assume_multiple %127, 8 : i32
    %129 = arith.truncf %124 : vector<8x128xf32> to vector<8x128xbf16>
    %cst_50 = arith.constant dense<0.000000e+00> : vector<8x512xf32>
    %130 = tpu.matmul %129, %14, %cst_50 {dimension_numbers = #tpu.dot_dimension_numbers<[1], [0], [0], [1], [0, 0, 1, 1], [], []>} : vector<8x128xbf16>, vector<128x512xbf16>, vector<8x512xf32> -> vector<8x512xf32>
    %131 = arith.index_cast %128 : i32 to index
    %c0_51 = arith.constant 0 : index
    %132 = vector.load %arg16[%131, %c0_51] : memref<64x512xf32, #tpu.memory_space<vmem>>, vector<8x512xf32>
    %133 = arith.addf %132, %130 : vector<8x512xf32>
    %134 = vector.extract_strided_slice %133 {offsets = [0, 0], sizes = [8, 384], strides = [1, 1]} : vector<8x512xf32> to vector<8x384xf32>
    %cst_52 = arith.constant 5.000000e-01 : f32
    %135 = vector.broadcast %cst_52 : f32 to vector<8x384xf32>
    %136 = arith.mulf %135, %134 : vector<8x384xf32>
    %137 = math.tanh %136 : vector<8x384xf32>
    %cst_53 = arith.constant 5.000000e-01 : f32
    %138 = vector.broadcast %cst_53 : f32 to vector<8x384xf32>
    %139 = arith.mulf %138, %137 : vector<8x384xf32>
    %cst_54 = arith.constant 5.000000e-01 : f32
    %140 = vector.broadcast %cst_54 : f32 to vector<8x384xf32>
    %141 = arith.addf %139, %140 : vector<8x384xf32>
    %142 = vector.extract_strided_slice %141 {offsets = [0, 0], sizes = [8, 128], strides = [1, 1]} : vector<8x384xf32> to vector<8x128xf32>
    %143 = vector.extract_strided_slice %141 {offsets = [0, 128], sizes = [8, 128], strides = [1, 1]} : vector<8x384xf32> to vector<8x128xf32>
    %144 = vector.extract_strided_slice %141 {offsets = [0, 256], sizes = [8, 128], strides = [1, 1]} : vector<8x384xf32> to vector<8x128xf32>
    %145 = vector.extract_strided_slice %133 {offsets = [0, 384], sizes = [8, 128], strides = [1, 1]} : vector<8x512xf32> to vector<8x128xf32>
    %146 = math.tanh %145 : vector<8x128xf32>
    %147 = arith.mulf %143, %122 : vector<8x128xf32>
    %148 = arith.mulf %142, %146 : vector<8x128xf32>
    %149 = arith.addf %147, %148 : vector<8x128xf32>
    %150 = math.tanh %149 : vector<8x128xf32>
    %151 = arith.mulf %144, %150 : vector<8x128xf32>
    %152 = arith.index_cast %128 : i32 to index
    %c0_55 = arith.constant 0 : index
    %153 = vector.load %arg15[%152, %c0_55] : memref<64x128xf32, #tpu.memory_space<vmem>>, vector<8x128xf32>
    tpu.vector_store %arg15[%152, %c0_55], %151 {strides = array<i32>} : memref<64x128xf32, #tpu.memory_space<vmem>>, vector<8x128xf32>,
    %c5_i32 = arith.constant 5 : i32
    %c8_i32_56 = arith.constant 8 : i32
    %154 = arith.muli %c5_i32, %c8_i32_56 : i32
    %155 = tpu.assume_multiple %154, 8 : i32
    %156 = arith.truncf %151 : vector<8x128xf32> to vector<8x128xbf16>
    %cst_57 = arith.constant dense<0.000000e+00> : vector<8x512xf32>
    %157 = tpu.matmul %156, %14, %cst_57 {dimension_numbers = #tpu.dot_dimension_numbers<[1], [0], [0], [1], [0, 0, 1, 1], [], []>} : vector<8x128xbf16>, vector<128x512xbf16>, vector<8x512xf32> -> vector<8x512xf32>
    %158 = arith.index_cast %155 : i32 to index
    %c0_58 = arith.constant 0 : index
    %159 = vector.load %arg16[%158, %c0_58] : memref<64x512xf32, #tpu.memory_space<vmem>>, vector<8x512xf32>
    %160 = arith.addf %159, %157 : vector<8x512xf32>
    %161 = vector.extract_strided_slice %160 {offsets = [0, 0], sizes = [8, 384], strides = [1, 1]} : vector<8x512xf32> to vector<8x384xf32>
    %cst_59 = arith.constant 5.000000e-01 : f32
    %162 = vector.broadcast %cst_59 : f32 to vector<8x384xf32>
    %163 = arith.mulf %162, %161 : vector<8x384xf32>
    %164 = math.tanh %163 : vector<8x384xf32>
    %cst_60 = arith.constant 5.000000e-01 : f32
    %165 = vector.broadcast %cst_60 : f32 to vector<8x384xf32>
    %166 = arith.mulf %165, %164 : vector<8x384xf32>
    %cst_61 = arith.constant 5.000000e-01 : f32
    %167 = vector.broadcast %cst_61 : f32 to vector<8x384xf32>
    %168 = arith.addf %166, %167 : vector<8x384xf32>
    %169 = vector.extract_strided_slice %168 {offsets = [0, 0], sizes = [8, 128], strides = [1, 1]} : vector<8x384xf32> to vector<8x128xf32>
    %170 = vector.extract_strided_slice %168 {offsets = [0, 128], sizes = [8, 128], strides = [1, 1]} : vector<8x384xf32> to vector<8x128xf32>
    %171 = vector.extract_strided_slice %168 {offsets = [0, 256], sizes = [8, 128], strides = [1, 1]} : vector<8x384xf32> to vector<8x128xf32>
    %172 = vector.extract_strided_slice %160 {offsets = [0, 384], sizes = [8, 128], strides = [1, 1]} : vector<8x512xf32> to vector<8x128xf32>
    %173 = math.tanh %172 : vector<8x128xf32>
    %174 = arith.mulf %170, %149 : vector<8x128xf32>
    %175 = arith.mulf %169, %173 : vector<8x128xf32>
    %176 = arith.addf %174, %175 : vector<8x128xf32>
    %177 = math.tanh %176 : vector<8x128xf32>
    %178 = arith.mulf %171, %177 : vector<8x128xf32>
    %179 = arith.index_cast %155 : i32 to index
    %c0_62 = arith.constant 0 : index
    %180 = vector.load %arg15[%179, %c0_62] : memref<64x128xf32, #tpu.memory_space<vmem>>, vector<8x128xf32>
    tpu.vector_store %arg15[%179, %c0_62], %178 {strides = array<i32>} : memref<64x128xf32, #tpu.memory_space<vmem>>, vector<8x128xf32>,
    %c6_i32 = arith.constant 6 : i32
    %c8_i32_63 = arith.constant 8 : i32
    %181 = arith.muli %c6_i32, %c8_i32_63 : i32
    %182 = tpu.assume_multiple %181, 8 : i32
    %183 = arith.truncf %178 : vector<8x128xf32> to vector<8x128xbf16>
    %cst_64 = arith.constant dense<0.000000e+00> : vector<8x512xf32>
    %184 = tpu.matmul %183, %14, %cst_64 {dimension_numbers = #tpu.dot_dimension_numbers<[1], [0], [0], [1], [0, 0, 1, 1], [], []>} : vector<8x128xbf16>, vector<128x512xbf16>, vector<8x512xf32> -> vector<8x512xf32>
    %185 = arith.index_cast %182 : i32 to index
    %c0_65 = arith.constant 0 : index
    %186 = vector.load %arg16[%185, %c0_65] : memref<64x512xf32, #tpu.memory_space<vmem>>, vector<8x512xf32>
    %187 = arith.addf %186, %184 : vector<8x512xf32>
    %188 = vector.extract_strided_slice %187 {offsets = [0, 0], sizes = [8, 384], strides = [1, 1]} : vector<8x512xf32> to vector<8x384xf32>
    %cst_66 = arith.constant 5.000000e-01 : f32
    %189 = vector.broadcast %cst_66 : f32 to vector<8x384xf32>
    %190 = arith.mulf %189, %188 : vector<8x384xf32>
    %191 = math.tanh %190 : vector<8x384xf32>
    %cst_67 = arith.constant 5.000000e-01 : f32
    %192 = vector.broadcast %cst_67 : f32 to vector<8x384xf32>
    %193 = arith.mulf %192, %191 : vector<8x384xf32>
    %cst_68 = arith.constant 5.000000e-01 : f32
    %194 = vector.broadcast %cst_68 : f32 to vector<8x384xf32>
    %195 = arith.addf %193, %194 : vector<8x384xf32>
    %196 = vector.extract_strided_slice %195 {offsets = [0, 0], sizes = [8, 128], strides = [1, 1]} : vector<8x384xf32> to vector<8x128xf32>
    %197 = vector.extract_strided_slice %195 {offsets = [0, 128], sizes = [8, 128], strides = [1, 1]} : vector<8x384xf32> to vector<8x128xf32>
    %198 = vector.extract_strided_slice %195 {offsets = [0, 256], sizes = [8, 128], strides = [1, 1]} : vector<8x384xf32> to vector<8x128xf32>
    %199 = vector.extract_strided_slice %187 {offsets = [0, 384], sizes = [8, 128], strides = [1, 1]} : vector<8x512xf32> to vector<8x128xf32>
    %200 = math.tanh %199 : vector<8x128xf32>
    %201 = arith.mulf %197, %176 : vector<8x128xf32>
    %202 = arith.mulf %196, %200 : vector<8x128xf32>
    %203 = arith.addf %201, %202 : vector<8x128xf32>
    %204 = math.tanh %203 : vector<8x128xf32>
    %205 = arith.mulf %198, %204 : vector<8x128xf32>
    %206 = arith.index_cast %182 : i32 to index
    %c0_69 = arith.constant 0 : index
    %207 = vector.load %arg15[%206, %c0_69] : memref<64x128xf32, #tpu.memory_space<vmem>>, vector<8x128xf32>
    tpu.vector_store %arg15[%206, %c0_69], %205 {strides = array<i32>} : memref<64x128xf32, #tpu.memory_space<vmem>>, vector<8x128xf32>,
    %c7_i32 = arith.constant 7 : i32
    %c8_i32_70 = arith.constant 8 : i32
    %208 = arith.muli %c7_i32, %c8_i32_70 : i32
    %209 = tpu.assume_multiple %208, 8 : i32
    %210 = arith.truncf %205 : vector<8x128xf32> to vector<8x128xbf16>
    %cst_71 = arith.constant dense<0.000000e+00> : vector<8x512xf32>
    %211 = tpu.matmul %210, %14, %cst_71 {dimension_numbers = #tpu.dot_dimension_numbers<[1], [0], [0], [1], [0, 0, 1, 1], [], []>} : vector<8x128xbf16>, vector<128x512xbf16>, vector<8x512xf32> -> vector<8x512xf32>
    %212 = arith.index_cast %209 : i32 to index
    %c0_72 = arith.constant 0 : index
    %213 = vector.load %arg16[%212, %c0_72] : memref<64x512xf32, #tpu.memory_space<vmem>>, vector<8x512xf32>
    %214 = arith.addf %213, %211 : vector<8x512xf32>
    %215 = vector.extract_strided_slice %214 {offsets = [0, 0], sizes = [8, 384], strides = [1, 1]} : vector<8x512xf32> to vector<8x384xf32>
    %cst_73 = arith.constant 5.000000e-01 : f32
    %216 = vector.broadcast %cst_73 : f32 to vector<8x384xf32>
    %217 = arith.mulf %216, %215 : vector<8x384xf32>
    %218 = math.tanh %217 : vector<8x384xf32>
    %cst_74 = arith.constant 5.000000e-01 : f32
    %219 = vector.broadcast %cst_74 : f32 to vector<8x384xf32>
    %220 = arith.mulf %219, %218 : vector<8x384xf32>
    %cst_75 = arith.constant 5.000000e-01 : f32
    %221 = vector.broadcast %cst_75 : f32 to vector<8x384xf32>
    %222 = arith.addf %220, %221 : vector<8x384xf32>
    %223 = vector.extract_strided_slice %222 {offsets = [0, 0], sizes = [8, 128], strides = [1, 1]} : vector<8x384xf32> to vector<8x128xf32>
    %224 = vector.extract_strided_slice %222 {offsets = [0, 128], sizes = [8, 128], strides = [1, 1]} : vector<8x384xf32> to vector<8x128xf32>
    %225 = vector.extract_strided_slice %222 {offsets = [0, 256], sizes = [8, 128], strides = [1, 1]} : vector<8x384xf32> to vector<8x128xf32>
    %226 = vector.extract_strided_slice %214 {offsets = [0, 384], sizes = [8, 128], strides = [1, 1]} : vector<8x512xf32> to vector<8x128xf32>
    %227 = math.tanh %226 : vector<8x128xf32>
    %228 = arith.mulf %224, %203 : vector<8x128xf32>
    %229 = arith.mulf %223, %227 : vector<8x128xf32>
    %230 = arith.addf %228, %229 : vector<8x128xf32>
    %231 = math.tanh %230 : vector<8x128xf32>
    %232 = arith.mulf %225, %231 : vector<8x128xf32>
    %233 = arith.index_cast %209 : i32 to index
    %c0_76 = arith.constant 0 : index
    %234 = vector.load %arg15[%233, %c0_76] : memref<64x128xf32, #tpu.memory_space<vmem>>, vector<8x128xf32>
    tpu.vector_store %arg15[%233, %c0_76], %232 {strides = array<i32>} : memref<64x128xf32, #tpu.memory_space<vmem>>, vector<8x128xf32>,
    %c8_i32_77 = arith.constant 8 : i32
    %c0_78 = arith.constant 0 : index
    %c0_79 = arith.constant 0 : index
    %c0_80 = arith.constant 0 : index
    %c0_81 = arith.constant 0 : index
    %235 = vector.load %arg13[%c0_78, %c0_79, %c0_80, %c0_81] : memref<1x1x8x128xf32, #tpu.memory_space<vmem>>, vector<1x1x8x128xf32>
    %236 = vector.shape_cast %235 : vector<1x1x8x128xf32> to vector<8x128xf32>
    %237 = vector.shape_cast %232 : vector<8x128xf32> to vector<1x1x8x128xf32>
    tpu.vector_store %arg13[%c0_78, %c0_79, %c0_80, %c0_81], %237 {strides = array<i32>} : memref<1x1x8x128xf32, #tpu.memory_space<vmem>>, vector<1x1x8x128xf32>,
    %c0_82 = arith.constant 0 : index
    %c0_83 = arith.constant 0 : index
    %c0_84 = arith.constant 0 : index
    %c0_85 = arith.constant 0 : index
    %238 = vector.load %arg14[%c0_82, %c0_83, %c0_84, %c0_85] : memref<1x1x8x128xf32, #tpu.memory_space<vmem>>, vector<1x1x8x128xf32>
    %239 = vector.shape_cast %238 : vector<1x1x8x128xf32> to vector<8x128xf32>
    %240 = vector.shape_cast %230 : vector<8x128xf32> to vector<1x1x8x128xf32>
    tpu.vector_store %arg14[%c0_82, %c0_83, %c0_84, %c0_85], %240 {strides = array<i32>} : memref<1x1x8x128xf32, #tpu.memory_space<vmem>>, vector<1x1x8x128xf32>,
    %c1_i32_86 = arith.constant 1 : i32
    %241 = arith.cmpi eq, %arg1, %c1_i32_86 : i32
    %242 = arith.extui %241 : i1 to i32
    %c0_i32_87 = arith.constant 0 : i32
    %243 = arith.cmpi ne, %242, %c0_i32_87 : i32
    scf.if %243 {
      %c0_88 = arith.constant 0 : index
      %c0_89 = arith.constant 0 : index
      %244 = vector.load %arg15[%c0_88, %c0_89] : memref<64x128xf32, #tpu.memory_space<vmem>>, vector<64x128xf32>
      %245 = arith.truncf %244 : vector<64x128xf32> to vector<64x128xbf16>
      %c0_90 = arith.constant 0 : index
      %c0_91 = arith.constant 0 : index
      %246 = vector.load %arg8[%c0_90, %c0_91] : memref<128x128xbf16, #tpu.memory_space<vmem>>, vector<128x128xbf16>
      %cst_92 = arith.constant dense<0.000000e+00> : vector<64x128xf32>
      %247 = tpu.matmul %245, %246, %cst_92 {dimension_numbers = #tpu.dot_dimension_numbers<[1], [0], [0], [1], [0, 0, 1, 1], [], []>} : vector<64x128xbf16>, vector<128x128xbf16>, vector<64x128xf32> -> vector<64x128xf32>
      %c0_93 = arith.constant 0 : index
      %c0_94 = arith.constant 0 : index
      %248 = vector.load %arg9[%c0_93, %c0_94] : memref<1x128xf32, #tpu.memory_space<vmem>>, vector<1x128xf32>
      %249 = vector.broadcast %248 : vector<1x128xf32> to vector<64x128xf32>
      %250 = arith.addf %247, %249 : vector<64x128xf32>
      %c0_95 = arith.constant 0 : index
      %c0_96 = arith.constant 0 : index
      %c0_97 = arith.constant 0 : index
      %251 = vector.load %arg12[%c0_95, %c0_96, %c0_97] : memref<1x64x128xf32, #tpu.memory_space<vmem>>, vector<1x64x128xf32>
      %252 = vector.shape_cast %251 : vector<1x64x128xf32> to vector<64x128xf32>
      %253 = vector.shape_cast %250 : vector<64x128xf32> to vector<1x64x128xf32>
      tpu.vector_store %arg12[%c0_95, %c0_96, %c0_97], %253 {strides = array<i32>} : memref<1x64x128xf32, #tpu.memory_space<vmem>>, vector<1x64x128xf32>,
    } else {
    }
    return
  }
  func.func @transform_0(%arg0: i32, %arg1: i32) -> (i32, i32, i32) {
    %c0_i32 = arith.constant 0 : i32
    %c0_i32_0 = arith.constant 0 : i32
    %c0_i32_1 = arith.constant 0 : i32
    return %arg0, %c0_i32, %c0_i32_0 : i32, i32, i32
  }
  func.func @transform_1(%arg0: i32, %arg1: i32) -> (i32, i32) {
    %c0_i32 = arith.constant 0 : i32
    %c0_i32_0 = arith.constant 0 : i32
    %c0_i32_1 = arith.constant 0 : i32
    return %c0_i32, %c0_i32_0 : i32, i32
  }
  func.func @transform_2(%arg0: i32, %arg1: i32) -> (i32, i32) {
    %c0_i32 = arith.constant 0 : i32
    %c0_i32_0 = arith.constant 0 : i32
    %c0_i32_1 = arith.constant 0 : i32
    return %c0_i32, %c0_i32_0 : i32, i32
  }
  func.func @transform_3(%arg0: i32, %arg1: i32) -> (i32, i32, i32) {
    %c0_i32 = arith.constant 0 : i32
    %c0_i32_0 = arith.constant 0 : i32
    %c0_i32_1 = arith.constant 0 : i32
    return %arg1, %c0_i32, %c0_i32_0 : i32, i32, i32
  }
  func.func @transform_4(%arg0: i32, %arg1: i32) -> (i32, i32, i32) {
    %c0_i32 = arith.constant 0 : i32
    %c0_i32_0 = arith.constant 0 : i32
    %c0_i32_1 = arith.constant 0 : i32
    return %arg1, %c0_i32, %c0_i32_0 : i32, i32, i32
  }
  func.func @transform_5(%arg0: i32, %arg1: i32) -> (i32, i32, i32) {
    %c0_i32 = arith.constant 0 : i32
    %c0_i32_0 = arith.constant 0 : i32
    %c0_i32_1 = arith.constant 0 : i32
    return %arg1, %c0_i32, %c0_i32_0 : i32, i32, i32
  }
  func.func @transform_6(%arg0: i32, %arg1: i32) -> (i32, i32) {
    %c0_i32 = arith.constant 0 : i32
    %c0_i32_0 = arith.constant 0 : i32
    %c0_i32_1 = arith.constant 0 : i32
    return %c0_i32, %c0_i32_0 : i32, i32
  }
  func.func @transform_7(%arg0: i32, %arg1: i32) -> (i32, i32) {
    %c0_i32 = arith.constant 0 : i32
    %c0_i32_0 = arith.constant 0 : i32
    %c0_i32_1 = arith.constant 0 : i32
    return %c0_i32, %c0_i32_0 : i32, i32
  }
  func.func @transform_8(%arg0: i32, %arg1: i32) -> (i32, i32, i32, i32) {
    %c0_i32 = arith.constant 0 : i32
    %c0_i32_0 = arith.constant 0 : i32
    %c0_i32_1 = arith.constant 0 : i32
    return %arg1, %arg0, %c0_i32, %c0_i32_0 : i32, i32, i32, i32
  }
  func.func @transform_9(%arg0: i32, %arg1: i32) -> (i32, i32, i32, i32) {
    %c0_i32 = arith.constant 0 : i32
    %c0_i32_0 = arith.constant 0 : i32
    %c0_i32_1 = arith.constant 0 : i32
    return %arg1, %arg0, %c0_i32, %c0_i32_0 : i32, i32, i32, i32
  }
  func.func @transform_10(%arg0: i32, %arg1: i32) -> (i32, i32, i32) {
    %c0_i32 = arith.constant 0 : i32
    %c0_i32_0 = arith.constant 0 : i32
    %c0_i32_1 = arith.constant 0 : i32
    return %arg0, %c0_i32, %c0_i32_0 : i32, i32, i32
  }
  func.func @transform_11(%arg0: i32, %arg1: i32) -> (i32, i32, i32, i32) {
    %c0_i32 = arith.constant 0 : i32
    %c0_i32_0 = arith.constant 0 : i32
    %c0_i32_1 = arith.constant 0 : i32
    return %arg1, %arg0, %c0_i32, %c0_i32_0 : i32, i32, i32, i32
  }
  func.func @transform_12(%arg0: i32, %arg1: i32) -> (i32, i32, i32, i32) {
    %c0_i32 = arith.constant 0 : i32
    %c0_i32_0 = arith.constant 0 : i32
    %c0_i32_1 = arith.constant 0 : i32
    return %arg1, %arg0, %c0_i32, %c0_i32_0 : i32, i32, i32, i32
  }
}

</mosaic_0001>

<bundles_post_ra>
// kernel: tpu_custom_call.1
= control target key start
LH: loop header
LB: loop body
LE: loop exit
PB: predicated region body
PF: predicated region fallthrough
CT: control target
= control target key end

     0   :  { %s4871_s0 = inlined_call_operand.hbm [shape: bf16[1,64,64], index: 0, kind: input, shape index: {}]   ;;  %s4872_s1 = inlined_call_operand.hbm [shape: bf16[64,128], index: 1, kind: input, shape index: {}]   ;;  %s4873_s2 = inlined_call_operand.hbm [shape: f32[1,128], index: 2, kind: input, shape index: {}]   ;;  %s4874_s3 = inlined_call_operand.hbm [shape: bf16[2,128,512], index: 3, kind: input, shape index: {}]   ;;  %s4875_s4 = inlined_call_operand.hbm [shape: bf16[2,128,512], index: 4, kind: input, shape index: {}]   ;;  %s4876_s5 = inlined_call_operand.hbm [shape: f32[2,1,512], index: 5, kind: input, shape index: {}]   ;;  %s4877_s6 = inlined_call_operand.hbm [shape: bf16[128,128], index: 6, kind: input, shape index: {}]   ;;  %s4878_s7 = inlined_call_operand.hbm [shape: f32[1,128], index: 7, kind: input, shape index: {}]   ;;  %s4879_s8 = inlined_call_operand.hbm [shape: f32[2,1,8,128], index: 8, kind: input, shape index: {}]   ;;  %s4880_s9 = inlined_call_operand.vmem [shape: f32[2,1,8,128], index: 9, kind: input, shape index: {}]   ;;  %s4881_s10 = inlined_call_operand.hbm [shape: f32[1,64,128], index: 10, kind: output, shape index: {0}]   ;;  %s4882_s11 = inlined_call_operand.hbm [shape: f32[2,1,8,128], index: 11, kind: output, shape index: {1}]   ;;  %s4883_s12 = inlined_call_operand.hbm [shape: f32[2,1,8,128], index: 12, kind: output, shape index: {2}]  }
   0x1   :  { %4902 = sst [smem:[#allocation57_spill]] %s4871_s0 }
   0x2   :  { %4903 = sst [smem:[#allocation58_spill]] %s4872_s1 }
   0x3   :  { %4904 = sst [smem:[#allocation59_spill]] %s4874_s3 }
   0x4   :  { %4905 = sst [smem:[#allocation60_spill]] %s4877_s6 }
   0x5   :  { %4906 = sst [smem:[#allocation61_spill]] %s4880_s9 }
   0x6   :  { %4907 = sst [smem:[#allocation62_spill]] %s4881_s10 }
   0x7   :  { %4908 = sst [smem:[#allocation63_spill]] %s4882_s11 }
   0x8   :  { %4909 = sst [smem:[#allocation64_spill]] %s4883_s12 }
   0x9   :  { %18 = vsyncpa [#allocation5], 0 }
   0xa   :  { %19 = vsyncpa [#allocation8], 0 }
   0xb   :  { %20 = vsyncpa [#allocation11], 0 }
   0xc   :  { %22 = vsyncpa [#allocation11 + $0x1], 0 }
   0xd   :  { %23 = vsyncpa [#allocation14], 0 }
   0xe   :  { %25 = vsyncpa [#allocation14 + $0x1], 0 }
   0xf   :  { %26 = vsyncpa [#allocation17], 0 }
  0x10   :  { %27 = vsyncpa [#allocation6], 0 }
  0x11   :  { %28 = vsyncpa [#allocation21], 0 }
  0x12   :  { %30 = vsyncpa [#allocation21 + $0x1], 0  ;;  %s3898_s21 = smov 0   ;;  %s3900_s22 = smov 0  }
  0x13   :  { %s3902_s23 = smov 0   ;;  %s3904_s24 = smov 0  }
  0x14   :  { %s3906_s25 = smov 0   ;;  %s3908_s26 = smov 0  }
  0x15 LB: > { %4910 = sst [smem:[#allocation32_spill]] %s3800_s23  ;;  %s3929_s27 = sadd.s32 4294967295, %s3812_s26   ;;  %s3812_s26 = sphi %s3908_s26, %s36_s26   ;;  %s3808_s25 = sphi %s3906_s25, %s5002_s25   ;;  %s3804_s24 = sphi %s3904_s24, %s5001_s24   ;;  %s3800_s23 = sphi %s3902_s23, %s4997_s23   ;;  %s3796_s22 = sphi %s3900_s22, %s5000_s22   ;;  %s3792_s21 = sphi %s3898_s21, %s4999_s21  }
  0x16   : > { %4911 = sst [smem:[#allocation33_spill]] %s3804_s24  ;;  %p2827_p0 = scmp.ge.s32.totalorder %s3812_s26, 1 }
  0x17   : > { %4912 = sst [smem:[#allocation34_spill]] %s3812_s26  ;;  %p4890_p1 = scmp.eq.s32.totalorder %s3929_s27, 0 }
  0x18   : > { %p4889_p2 = scmp.eq.s32.totalorder %s3929_s27, 1  ;;  %p379_p3 = scmp.lt.s32.totalorder %s3812_s26, 3 }
  0x19   : > { %s3814_s29 = smov [#allocation4]   ;;  %s3815_s14 = smov [#allocation7]  }
  0x1a   : > { %p3935_p4 = pnand %p2827_p0, %p379_p3  ;;  %s394_s30 = sshll.u32 %s3814_s29, 4  ;;  %s395_s30 = int_to_ptr.vmem [resolvable:$true] %s394_s30 }
  0x1b   : > { %s407_s15 = sshll.u32 %s3815_s14, 4  ;;  %s3816_s16 = smov [#allocation15]   ;;  %s3948_s15 = int_to_ptr.vmem [resolvable:$true] %s407_s15 }
  0x1c   : > { %p3077_p5 = pneg %p3935_p4  ;;  %s431_s17 = sshll.u32 %s3816_s16, 4  ;;  %s3950_s17 = int_to_ptr.vmem [resolvable:$true] %s431_s17 }
  0x1d   : > { %s3423_s19 = scalar_lea.vmem %s395_s30, 512  ;;  %p3431_p12 = scmp.lt.s32.totalorder %s395_s30, %s395_s30 }
  0x1e   : > { %p3944_p7 = pnand %p3077_p5, %p4890_p1  ;;  %p3424_p9 = scmp.ne.s32.totalorder %s395_s30, %s3423_s19 }
  0x1f   : > { %p3432_p13 = scmp.lt.s32.totalorder %s3423_s19, %s3423_s19 }
  0x20   : > { %p3954_p8 = pneg %p3944_p7 }
  0x21   : > { %p3433_p0 = por %p3432_p13, %p3431_p12 }
  0x22   : > { %p3426_p10 = pnand %p3424_p9, %p3954_p8 }
  0x24   : > { %p3427_p11 = pneg %p3426_p10 }
  0x26   : > { %p3434_p3 = pnand %p3433_p0, %p3427_p11 }
  0x28   : > { %3437 = shalt.err (!%p3434_p3)
}
  0x29   : > { %s3817_s20 = smov 64   ;;  %s3818_s29 = smov 4  }
  0x2a   : > { %s4916_s0 = sld [smem:[#allocation57_spill]]  ;;  %s3449_s10 = scalar_lea.vmem %s3948_s15, 512 }
  0x2b   : > { %p3450_p5 = scmp.ne.s32.totalorder %s3948_s15, %s3449_s10  ;;  %p3457_p11 = scmp.lt.s32.totalorder %s3948_s15, %s3948_s15 }
  0x2c   : > { %p3458_p12 = scmp.lt.s32.totalorder %s3449_s10, %s3449_s10 }
  0x2d   : > { %p3452_p9 = pnand %p3450_p5, %p3954_p8 }
  0x2e   : > { %p3459_p13 = por %p3458_p12, %p3457_p11 }
  0x2f   : > { %p3453_p10 = pneg %p3452_p9 }
  0x30   : > { %3080 = dma.hbm_to_vmem [thread:$0]  (!%p3944_p7), %s4916_s0, 512, %s395_s30, [#allocation5], %s3817_s20, %s3817_s20, %s3818_s29  }
  0x31   : > { %p3460_p0 = pnand %p3459_p13, %p3453_p10 }
  0x33   : > { %3463 = shalt.err (!%p3460_p0)
}
  0x34   : > { %s4917_s1 = sld [smem:[#allocation58_spill]]  ;;  %s3475_s30 = scalar_lea.vmem %s3950_s17, 1024 }
  0x35   : > { %p3476_p3 = scmp.ne.s32.totalorder %s3950_s17, %s3475_s30  ;;  %p3483_p11 = scmp.lt.s32.totalorder %s3950_s17, %s3950_s17 }
  0x36   : > { %p3484_p10 = scmp.lt.s32.totalorder %s3475_s30, %s3475_s30 }
  0x37   : > { %p3478_p5 = pnand %p3476_p3, %p3954_p8 }
  0x38   : > { %p3485_p12 = por %p3484_p10, %p3483_p11 }
  0x39   : > { %p3479_p9 = pneg %p3478_p5 }
  0x3a   : > { %3083 = dma.hbm_to_vmem [thread:$0]  (!%p3944_p7), %s4917_s1, 512, %s3948_s15, [#allocation8], %s3817_s20, %s3817_s20, %s3818_s29  }
  0x3b   : > { %p3486_p13 = pnand %p3485_p12, %p3479_p9 }
  0x3d   : > { %3489 = shalt.err (!%p3486_p13)
}
  0x3e   : > { %s4918_s6 = sld [smem:[#allocation60_spill]]  ;;  %s4885_s15 = sadd.s32 4294967294, %s3812_s26  }
  0x3f   : > { %s45_s14 = sadd.s32 1, %s3808_s25  ;;  %s123_s16 = sadd.s32 1, %s3800_s23 }
  0x40   : > { %p46_p0 = scmp.ge.s32.totalorder %s45_s14, 2  ;;  %p130_p3 = scmp.ne.s32.totalorder %s3800_s23, %s3796_s22 }
  0x41   : > { %p131_p5 = scmp.eq.s32.totalorder %s3812_s26, 0  ;;  %p136_p11 = scmp.ne.s32.totalorder %s3796_s22, %s3792_s21 }
  0x42   : > { %s5004_s14 = smov (%p46_p0, %s45_s14), 0  ;;  %p4007_p10 = por %p4889_p2, %p130_p3 }
  0x43   : > { %4919 = sst [smem:[#allocation35_spill]] %s5004_s14  ;;  %p3997_p9 = por %p131_p5, %p130_p3 }
  0x44   : > { %3089 = dma.hbm_to_vmem [thread:$0]  (!%p3944_p7), %s4918_s6, 1024, %s3950_s17, [#allocation14], %s3817_s20, %s3817_s20, %s3818_s29  }
  0x45   : > { %s120_s17 = ssub.s32 %s3808_s25, %s5004_s14  ;;  %p4013_p13 = por %p4890_p1, %p136_p11 }
  0x46   : > { %s4921_s20 = scalar_select %p4007_p10, 1, 0 }
  0x47   : > { %p121_p12 = scmp.eq.s32.totalorder %s120_s17, 0  ;;  %p344_p0 = scmp.eq.s32.totalorder %s4885_s15, 1 }
  0x48   : > { %4922 = sst [smem:[#allocation36_spill]] %s4921_s20  ;;  %p3118_p5 = scmp.lt.s32.totalorder %s3812_s26, 2 }
  0x49   : > { %s4021_s30 = scalar_select %p121_p12, %s3800_s23, %s123_s16  }
  0x4a   : > { %p4023_p6 = por %p344_p0, %p136_p11  ;;  %s4028_s10 = sand.u32 1, %s3812_s26  }
  0x4b   : > { %4924 = sst [smem:[#allocation37_spill]] %s4021_s30  ;;  %s4031_s12 = sand.u32 1, %s3800_s23  }
  0x4c   : > { %s4925_s21 = scalar_select %p4023_p6, 1, 0 }
  0x4d   : > { %s4891_s17 = sshll.u32 %s4031_s12, 8  ;;  %s2954_s0 = sshll.u32 %s3808_s25, 12 }
  0x4e   : > { %4926 = sst [smem:[#allocation38_spill]] %s4925_s21  ;;  %s460_s16 = scalar_lea.vmem [#allocation10], %s4891_s17 }
  0x4f   : > { %s4927_s3 = sld [smem:[#allocation59_spill]]  ;;  %s467_s14 = sshll.u32 %s460_s16, 4  ;;  %s468_s14 = int_to_ptr.vmem [resolvable:$true] %s467_s14 }
  0x50   : > { %p4042_p3 = pnand %p3118_p5, %p3997_p9  ;;  %s457_s23 = scalar_lea.sflag [#allocation11], %s4028_s10 }
  0x51   : > { %s3503_s21 = scalar_lea.vmem %s468_s14, 4096  ;;  %s3819_s1 = smov [#allocation10]  }
  0x52   : > { %p4899_p11 = pneg %p4042_p3  ;;  %p3504_p12 = scmp.ne.s32.totalorder %s468_s14, %s3503_s21 }
  0x53   : > { %s3508_s6 = sshll.u32 %s3819_s1, 4  ;;  %s3509_s6 = int_to_ptr.vmem [resolvable:$false] %s3508_s6 }
  0x54   : > { %p3506_p0 = pnand %p3504_p12, %p4899_p11  ;;  %s3510_s19 = scalar_lea.vmem %s3509_s6, 8192 }
  0x55   : > { %s466_s15 = scalar_lea.hbm %s4927_s3, %s2954_s0  ;;  %p3511_p9 = scmp.lt.s32.totalorder %s468_s14, %s3509_s6 }
  0x56   : > { %p3507_p2 = pneg %p3506_p0  ;;  %p3512_p5 = scmp.lt.s32.totalorder %s3510_s19, %s3503_s21 }
  0x58   : > { %p3513_p1 = por %p3512_p5, %p3511_p9 }
  0x5a   : > { %p3514_p6 = pnand %p3513_p1, %p3507_p2 }
  0x5c   : > { %3517 = shalt.err (!%p3514_p6)
}
  0x5d   : > { %s3820_s16 = smov 256   ;;  %s3821_s17 = smov 16  }
  0x5e   : > { %3096 = dma.hbm_to_vmem [thread:$0]  (!%p4042_p3), %s466_s15, 4096, %s468_s14, %s457_s23, %s3820_s16, %s3820_s16, %s3821_s17  }
  0x5f   : > { %s4062_s6 = scalar_lea.hbm %s4875_s4, %s2954_s0  ;;  %s4929_s21 = sshll.u32 %s4031_s12, 8 }
  0x60   : > { %s481_s19 = scalar_lea.vmem [#allocation12], %s4929_s21  ;;  %s3822_s11 = smov [#allocation9]  }
  0x61   : > { %s488_s26 = sshll.u32 %s481_s19, 4  ;;  %s421_s20 = sshll.u32 %s3822_s11, 4  ;;  %s4066_s26 = int_to_ptr.vmem [resolvable:$true] %s488_s26  ;;  %s422_s20 = int_to_ptr.vmem [resolvable:$true] %s421_s20 }
  0x62   : > { %s3529_s9 = scalar_lea.vmem %s422_s20, 16  ;;  %s3536_s24 = scalar_lea.vmem %s422_s20, 32 }
  0x63   : > { %p3530_p1 = scmp.ne.s32.totalorder %s422_s20, %s3529_s9  ;;  %p3537_p12 = scmp.lt.s32.totalorder %s422_s20, %s422_s20 }
  0x64   : > { %p3538_p0 = scmp.lt.s32.totalorder %s3536_s24, %s3529_s9 }
  0x65   : > { %p3532_p2 = pnand %p3530_p1, %p3954_p8 }
  0x66   : > { %p3539_p9 = por %p3538_p0, %p3537_p12 }
  0x67   : > { %p3533_p6 = pneg %p3532_p2 }
  0x69   : > { %p3540_p5 = pnand %p3539_p9, %p3533_p6 }
  0x6b   : > { %3543 = shalt.err (!%p3540_p5)
}
  0x6c   : > { %3086 = dma.hbm_to_vmem [thread:$0]  (!%p3944_p7), %s4873_s2, 16, %s422_s20, [#allocation8]  }
  0x6d   : > { %s3823_s11 = smov [#allocation16]   ;;  %s2840_s14 = sshll.u32 %s4031_s12, 2 }
  0x6e   : > { %s445_s15 = sshll.u32 %s3823_s11, 4  ;;  %s446_s15 = int_to_ptr.vmem [resolvable:$true] %s445_s15 }
  0x6f   : > { %s3555_s1 = scalar_lea.vmem %s446_s15, 16  ;;  %s3562_s9 = scalar_lea.vmem %s446_s15, 32 }
  0x70   : > { %p3556_p1 = scmp.ne.s32.totalorder %s446_s15, %s3555_s1  ;;  %p3563_p6 = scmp.lt.s32.totalorder %s446_s15, %s446_s15 }
  0x71   : > { %p3564_p12 = scmp.lt.s32.totalorder %s3562_s9, %s3555_s1 }
  0x72   : > { %p3558_p2 = pnand %p3556_p1, %p3954_p8 }
  0x73   : > { %p3565_p0 = por %p3564_p12, %p3563_p6 }
  0x74   : > { %p3559_p11 = pneg %p3558_p2 }
  0x76   : > { %p3566_p9 = pnand %p3565_p0, %p3559_p11 }
  0x78   : > { %3569 = shalt.err (!%p3566_p9)
}
  0x79   : > { %3092 = dma.hbm_to_vmem [thread:$0]  (!%p3944_p7), %s4878_s7, 16, %s446_s15, [#allocation17]  }
  0x7a   : > { %s3583_s20 = scalar_lea.vmem %s4066_s26, 4096  ;;  %p4930_p8 = pneg %p4042_p3 }
  0x7b   : > { %p3584_p5 = scmp.ne.s32.totalorder %s4066_s26, %s3583_s20  ;;  %s3824_s18 = smov [#allocation12]  }
  0x7c   : > { %s3588_s19 = sshll.u32 %s3824_s18, 4  ;;  %s3589_s19 = int_to_ptr.vmem [resolvable:$false] %s3588_s19 }
  0x7d   : > { %p3586_p1 = pnand %p3584_p5, %p4930_p8  ;;  %s3590_s0 = scalar_lea.vmem %s3589_s19, 8192 }
  0x7e   : > { %p3591_p11 = scmp.lt.s32.totalorder %s4066_s26, %s3589_s19  ;;  %p3592_p6 = scmp.lt.s32.totalorder %s3590_s0, %s3583_s20 }
  0x7f   : > { %p3587_p2 = pneg %p3586_p1 }
  0x80   : > { %p3593_p12 = por %p3592_p6, %p3591_p11 }
  0x82   : > { %p3594_p0 = pnand %p3593_p12, %p3587_p2 }
  0x84   : > { %3597 = shalt.err (!%p3594_p0)
}
  0x85   : > { %3099 = dma.hbm_to_vmem [thread:$0]  (!%p4042_p3), %s4062_s6, 4096, %s4066_s26, %s457_s23, %s3820_s16, %s3820_s16, %s3821_s17  }
  0x86   : > { %s2956_s13 = sshll.u32 %s3808_s25, 6  ;;  %s502_s1 = scalar_lea.vmem [#allocation13], %s2840_s14 }
  0x87   : > { %s508_s15 = scalar_lea.hbm %s4876_s5, %s2956_s13  ;;  %s510_s9 = sshll.u32 %s502_s1, 4  ;;  %s511_s9 = int_to_ptr.vmem [resolvable:$true] %s510_s9 }
  0x88   : > { %s499_s24 = scalar_lea.sflag [#allocation14], %s4028_s10  ;;  %s3611_s21 = scalar_lea.vmem %s511_s9, 64 }
  0x89   : > { %p3612_p7 = scmp.ne.s32.totalorder %s511_s9, %s3611_s21  ;;  %p4931_p9 = pmov %p4930_p8 }
  0x8a   : > { %s3825_s20 = smov [#allocation13]  }
  0x8b   : > { %p3614_p5 = pnand %p3612_p7, %p4931_p9  ;;  %s3616_s18 = sshll.u32 %s3825_s20, 4  ;;  %s3617_s18 = int_to_ptr.vmem [resolvable:$false] %s3616_s18 }
  0x8c   : > { %s3618_s23 = scalar_lea.vmem %s3617_s18, 128  ;;  %p3619_p1 = scmp.lt.s32.totalorder %s511_s9, %s3617_s18 }
  0x8d   : > { %p3615_p8 = pneg %p3614_p5  ;;  %p3620_p2 = scmp.lt.s32.totalorder %s3618_s23, %s3611_s21 }
  0x8f   : > { %p3621_p11 = por %p3620_p2, %p3619_p1 }
  0x91   : > { %p3622_p6 = pnand %p3621_p11, %p3615_p8 }
  0x93   : > { %3625 = shalt.err (!%p3622_p6)
}
  0x94   : > { %3102 = dma.hbm_to_vmem [thread:$0]  (!%p4042_p3), %s508_s15, 64, %s511_s9, %s499_s24  }
  0x95   : > { %s2843_s26 = sshll.u32 %s4031_s12, 3  ;;  %s2844_s17 = sshll.u32 %s3808_s25, 7 }
  0x96   : > { %s527_s14 = scalar_lea.hbm %s4879_s8, %s2844_s17  ;;  %s521_s19 = scalar_lea.vmem [#allocation18], %s2843_s26 }
  0x97   : > { %s529_s0 = sshll.u32 %s521_s19, 4  ;;  %s518_s13 = scalar_lea.sflag [#allocation5], %s4028_s10  ;;  %s530_s0 = int_to_ptr.vmem [resolvable:$true] %s529_s0 }
  0x98   : > { %s3639_s3 = scalar_lea.vmem %s530_s0, 128  ;;  %p4932_p0 = pmov %p4931_p9 }
  0x99   : > { %p3640_p12 = scmp.ne.s32.totalorder %s530_s0, %s3639_s3  ;;  %s3826_s11 = smov [#allocation18]  }
  0x9a   : > { %s3644_s1 = sshll.u32 %s3826_s11, 4  ;;  %s3645_s1 = int_to_ptr.vmem [resolvable:$false] %s3644_s1 }
  0x9b   : > { %p3642_p7 = pnand %p3640_p12, %p4932_p0  ;;  %s3646_s15 = scalar_lea.vmem %s3645_s1, 256 }
  0x9c   : > { %p3647_p5 = scmp.lt.s32.totalorder %s530_s0, %s3645_s1  ;;  %p3648_p8 = scmp.lt.s32.totalorder %s3646_s15, %s3639_s3 }
  0x9d   : > { %p3643_p9 = pneg %p3642_p7 }
  0x9e   : > { %p3649_p1 = por %p3648_p8, %p3647_p5 }
  0xa0   : > { %p3650_p2 = pnand %p3649_p1, %p3643_p9 }
  0xa2   : > { %3653 = shalt.err (!%p3650_p2)
}
  0xa3   : > { %3105 = dma.hbm_to_vmem [thread:$0]  (!%p4042_p3), %s527_s14, 128, %s530_s0, %s518_s13  }
  0xa4   : > { %548 = sbr.rel (%p3935_p4) target bundleno = 2704 (0xa90), region = 60 }
  0xa9   : > { %p4933_p11 = scmp.eq.s32.totalorder %s3929_s27, 0 }
  0xab   : > { %3755 = dma.done.wait (%p4933_p11), [#allocation5], 512   ;;  %p4934_p6 = pmov %p4933_p11 }
  0xad   : > { %3757 = vsyncadd (%p4934_p6), [#allocation5], 4294966784  ;;  %p4935_p12 = pmov %p4934_p6 }
  0xae   : > { %p4936_p0 = pmov %p4934_p6 }
  0xaf   : > { %3759 = dma.done.wait (%p4935_p12), [#allocation8], 528  }
  0xb0   : > { %3761 = vsyncadd (%p4936_p0), [#allocation8], 4294966768  ;;  %s4132_s30 = sand.u32 1, %s3929_s27   ;;  %s564_s28 = sand.u32 1, %s3796_s22  }
  0xb1   : > { %s2849_s10 = sshll.u32 %s564_s28, 8  ;;  %s563_s12 = scalar_lea.sflag [#allocation11], %s4132_s30 }
  0xb2   : > { %s4136_s9 = scalar_lea.vmem [#allocation10], %s2849_s10 }
  0xb3   : > { %3763 = dma.done.wait (%p4013_p13), %s563_s12, 8192  }
  0xb4   : > { %3765 = vsyncadd (%p4013_p13), %s563_s12, 4294959104  ;;  %s2851_s24 = sshll.u32 %s564_s28, 2  ;;  %s4142_s21 = scalar_lea.vmem [#allocation12], %s2849_s10 }
  0xb5   : > { %s581_s20 = scalar_lea.sflag [#allocation14], %s4132_s30  ;;  %s4145_s18 = scalar_lea.vmem [#allocation13], %s2851_s24 }
  0xb6   : > { %3767 = dma.done.wait (%p4013_p13), %s581_s20, 64  }
  0xb7   : > { %3769 = vsyncadd (%p4013_p13), %s581_s20, 4294967232  ;;  %p4937_p4 = pmov %p4936_p0 }
  0xb8   : > { %p4938_p3 = pmov %p4936_p0 }
  0xb9   : > { %3771 = dma.done.wait (%p4937_p4), [#allocation14], 1024  }
  0xba   : > { %3773 = vsyncadd (%p4938_p3), [#allocation14], 4294966272  ;;  %p4939_p7 = pmov %p4936_p0 }
  0xbb   : > { %p4940_p9 = pmov %p4936_p0 }
  0xbc   : > { %3775 = dma.done.wait (%p4939_p7), [#allocation17], 16  }
  0xbd   : > { %3777 = vsyncadd (%p4940_p9), [#allocation17], 4294967280  ;;  %s4159_s23 = sshll.u32 %s564_s28, 3  ;;  %s598_s26 = scalar_lea.sflag [#allocation5], %s4132_s30 }
  0xbe   : > { %s601_s17 = scalar_lea.vmem [#allocation18], %s4159_s23 }
  0xbf   : > { %3779 = dma.done.wait (%p4013_p13), %s598_s26, 128  }
  0xc0   : > { %3781 = vsyncadd (%p4013_p13), %s598_s26, 4294967168  ;;  %s4941_s16 = sld [smem:[#allocation33_spill]]  ;;  %s661_s11 = scalar_lea.vmem [#allocation20], %s4159_s23 }
  0xc1   : > { %s4942_s13 = sld [smem:[#allocation61_spill]]  ;;  %s668_s1 = scalar_lea.vmem [#allocation22], %s4159_s23 }
  0xc6   : > { %p669_p5 = scmp.lt.s32.totalorder %s4941_s16, 1  ;;  %p2858_p8 = scmp.ne.s32.totalorder %s4941_s16, 0 }
  0xc8   : > { %s670_s6 = scalar_select %p669_p5, %s4941_s16, 1 }
  0xc9   : > { %680 = sbr.rel (%p2858_p8) target bundleno = 427 (0x1ab), region = 100 }
  0xca   : > { %s2857_s14 = sshll.u32 %s670_s6, 3 }
  0xcb   : > { %s4172_s3 = scalar_lea.vmem %s4942_s13, %s2857_s14 }
  0xce   : > { %v3188_v0 = vld [vmem:[#allocation7 + $0x18] sm:$0xff]   ;;  %v3189_v1 = vld [vmem:[#allocation7 + $0x10] sm:$0xff]   ;;  %v3190_v2 = vld [vmem:[#allocation7 + $0x8] sm:$0xff]   ;;  %vm748_vm0 = vcmask 523264  }
  0xcf   : > { %2977 = vmatprep.subr.bf16.mxu0 %v3188_v0  ;;  %3017 = vmatprep.subr.bf16.mxu1 %v3188_v0  ;;  %v3192_v3 = vld [vmem:[#allocation4] sm:$0xff]   ;;  %v3193_v4 = vld [vmem:[#allocation4 + $0x10] sm:$0xff]   ;;  %v3194_v6 = vld [vmem:[#allocation4 + $0x8] sm:$0xff]  }
  0xd0   : > { %2978 = vmatpush3.bf16.msra.mxu0 %v3188_v0  ;;  %3021 = vmatpush3.bf16.msra.mxu1 %v3188_v0  ;;  %v3191_v5 = vld [vmem:[#allocation7] sm:$0xff]   ;;  %v3195_v7 = vld [vmem:[#allocation4 + $0x18] sm:$0xff]  }
  0xd1   : > { %2979 = vmatprep.subr.bf16.mxu0 %v3189_v1  ;;  %3018 = vmatprep.subr.bf16.mxu1 %v3189_v1  ;;  %v2859_v8 = vld [vmem:[#allocation9] ss:$0 sm:$0xff] }
  0xd2   : > { %2985 = vmatprep.mubr.msk.bf16.mxu0 %vm748_vm0, %v3192_v3  ;;  %2989 = vmatprep.mubr.msk.bf16.mxu1 %vm748_vm0, %v3193_v4 }
  0xd4   : > { %2980 = vmatpush3.bf16.msra.mxu0 %v3189_v1  ;;  %3022 = vmatpush3.bf16.msra.mxu1 %v3189_v1 }
  0xd5   : > { %2981 = vmatprep.subr.bf16.mxu0 %v3190_v2  ;;  %3019 = vmatprep.subr.bf16.mxu1 %v3190_v2 }
  0xd8   : > { %2982 = vmatpush3.bf16.msra.mxu0 %v3190_v2  ;;  %3023 = vmatpush3.bf16.msra.mxu1 %v3190_v2 }
  0xd9   : > { %2983 = vmatprep.subr.bf16.mxu0 %v3191_v5  ;;  %3020 = vmatprep.subr.bf16.mxu1 %v3191_v5 }
  0xdc   : > { %2984 = vmatpush3.bf16.msra.mxu0 %v3191_v5  ;;  %3024 = vmatpush3.bf16.msra.mxu1 %v3191_v5 }
  0xdf   : > { %2986 = vmatmul.mubr.msk.bf16.vlgmr.msra.gmra.mxu0 %vm748_vm0, %v3194_v6  ;;  %2990 = vmatmul.mubr.msk.bf16.vlgmr.msra.gmra.mxu1 %vm748_vm0, %v3195_v7 }
 0x19f   : > { %v2987_v9 = vpop.f32.mrf.mxu0  ;;  %v2991_v10 = vpop.f32.mrf.mxu1 }
 0x1a0   : > { %v804_v11 = vadd.f32 %v2987_v9, %v2859_v8  ;;  %v820_v12 = vadd.f32 %v2991_v10, %v2859_v8 }
 0x1a1   : > { %v795_v13 = vpop.f32.mrf.mxu0  ;;  %v811_v14 = vpop.f32.mrf.mxu1 }
 0x1a2   : > { %v828_v15 = vmax.f32 %v804_v11, 0.0  ;;  %v832_v16 = vmax.f32 %v820_v12, 0.0  ;;  %v796_v17 = vadd.f32 %v2859_v8, %v795_v13  ;;  %v812_v18 = vadd.f32 %v2859_v8, %v811_v14 }
 0x1a3   : > { %v2988_v19 = vpop.f32.mrf.mxu0  ;;  %v2992_v20 = vpop.f32.mrf.mxu1 }
 0x1a4   : > { %836 = vst [vmem:[#allocation2 + $0x18] sm:$0xff] %v828_v15  ;;  %840 = vst [vmem:[#allocation2 + $0x28] sm:$0xff] %v832_v16  ;;  %v826_v21 = vmax.f32 %v796_v17, 0.0  ;;  %v830_v22 = vmax.f32 %v812_v18, 0.0  ;;  %v807_v23 = vadd.f32 %v2988_v19, %v2859_v8  ;;  %v823_v24 = vadd.f32 %v2992_v20, %v2859_v8 }
 0x1a5   : > { %v798_v25 = vpop.f32.mrf.mxu0  ;;  %v814_v26 = vpop.f32.mrf.mxu1 }
 0x1a6   : > { %834 = vst [vmem:[#allocation2 + $0x30] sm:$0xff] %v826_v21  ;;  %838 = vst [vmem:[#allocation2 + $0x8] sm:$0xff] %v830_v22  ;;  %v829_v27 = vmax.f32 %v807_v23, 0.0  ;;  %v833_v28 = vmax.f32 %v823_v24, 0.0  ;;  %v799_v29 = vadd.f32 %v2859_v8, %v798_v25  ;;  %v815_v30 = vadd.f32 %v2859_v8, %v814_v26 }
 0x1a8   : > { %837 = vst [vmem:[#allocation2 + $0x10] sm:$0xff] %v829_v27  ;;  %841 = vst [vmem:[#allocation2 + $0x38] sm:$0xff] %v833_v28  ;;  %v827_v31 = vmax.f32 %v799_v29, 0.0  ;;  %v831_v32 = vmax.f32 %v815_v30, 0.0 }
 0x1aa   : > { %835 = vst [vmem:[#allocation2] sm:$0xff] %v827_v31  ;;  %839 = vst [vmem:[#allocation2 + $0x20] sm:$0xff] %v831_v32 }
 0x1ab PF: > { %v3196_v33 = vld [vmem:[%s4136_s9 + $0xe4] ss:$16 sps:$4 sm:$0xff]   ;;  %v3198_v34 = vld [vmem:[%s4136_s9 + $0xec] ss:$16 sps:$4 sm:$0xff]   ;;  %v4900_v35 = vmov 0   ;;  %s4980_s29 = sld [smem:[#allocation33_spill]] }
 0x1ac   : > { %1100 = vmatprep.mubr.bf16.mxu0 %v4900_v35  ;;  %1173 = vmatprep.mubr.bf16.mxu1 %v4900_v35  ;;  %v3200_v36 = vld [vmem:[%s4136_s9 + $0xe0] ss:$16 sps:$4 sm:$0xff]   ;;  %v3201_v37 = vld [vmem:[%s4136_s9 + $0xe8] ss:$16 sps:$4 sm:$0xff]   ;;  %v3202_v38 = vld [vmem:[%s4136_s9 + $0xc4] ss:$16 sps:$4 sm:$0xff]  }
 0x1ad   : > { %1068 = vmatprep.subr.bf16.mxu0 %v3196_v33  ;;  %1141 = vmatprep.subr.bf16.mxu1 %v3198_v34  ;;  %v3204_v39 = vld [vmem:[%s4136_s9 + $0xcc] ss:$16 sps:$4 sm:$0xff]   ;;  %v3206_v40 = vld [vmem:[%s4136_s9 + $0xc0] ss:$16 sps:$4 sm:$0xff]   ;;  %v3207_v41 = vld [vmem:[%s4136_s9 + $0xc8] ss:$16 sps:$4 sm:$0xff]  }
 0x1ae   : > { %1069 = vmatpush1.bf16.msra.mxu0 %v3200_v36  ;;  %1142 = vmatpush1.bf16.msra.mxu1 %v3201_v37  ;;  %v3208_v42 = vld [vmem:[%s4136_s9 + $0xa4] ss:$16 sps:$4 sm:$0xff]   ;;  %v3210_v43 = vld [vmem:[%s4136_s9 + $0xac] ss:$16 sps:$4 sm:$0xff]   ;;  %v3212_v44 = vld [vmem:[%s4136_s9 + $0xa0] ss:$16 sps:$4 sm:$0xff]  }
 0x1af   : > { %1070 = vmatprep.subr.bf16.mxu0 %v3202_v38  ;;  %1143 = vmatprep.subr.bf16.mxu1 %v3204_v39  ;;  %v3213_v45 = vld [vmem:[%s4136_s9 + $0xa8] ss:$16 sps:$4 sm:$0xff]   ;;  %v3214_v46 = vld [vmem:[%s4136_s9 + $0x84] ss:$16 sps:$4 sm:$0xff]   ;;  %v3216_v47 = vld [vmem:[%s4136_s9 + $0x8c] ss:$16 sps:$4 sm:$0xff]  }
 0x1b0   : > { %v3218_v48 = vld [vmem:[%s4136_s9 + $0x80] ss:$16 sps:$4 sm:$0xff]   ;;  %v3219_v49 = vld [vmem:[%s4136_s9 + $0x88] ss:$16 sps:$4 sm:$0xff]   ;;  %v3220_v50 = vld [vmem:[%s4136_s9 + $0x64] ss:$16 sps:$4 sm:$0xff]  }
 0x1b1   : > { %v3222_v51 = vld [vmem:[%s4136_s9 + $0x6c] ss:$16 sps:$4 sm:$0xff]   ;;  %v3224_v52 = vld [vmem:[%s4136_s9 + $0x60] ss:$16 sps:$4 sm:$0xff]   ;;  %v3225_v53 = vld [vmem:[%s4136_s9 + $0x68] ss:$16 sps:$4 sm:$0xff]  }
 0x1b2   : > { %1071 = vmatpush1.bf16.msra.mxu0 %v3206_v40  ;;  %1144 = vmatpush1.bf16.msra.mxu1 %v3207_v41  ;;  %v3226_v54 = vld [vmem:[%s4136_s9 + $0x44] ss:$16 sps:$4 sm:$0xff]   ;;  %v3228_v55 = vld [vmem:[%s4136_s9 + $0x4c] ss:$16 sps:$4 sm:$0xff]   ;;  %v3230_v56 = vld [vmem:[%s4136_s9 + $0x40] ss:$16 sps:$4 sm:$0xff]  }
 0x1b3   : > { %1072 = vmatprep.subr.bf16.mxu0 %v3208_v42  ;;  %1145 = vmatprep.subr.bf16.mxu1 %v3210_v43  ;;  %v3231_v57 = vld [vmem:[%s4136_s9 + $0x48] ss:$16 sps:$4 sm:$0xff]   ;;  %v3232_v58 = vld [vmem:[%s4136_s9 + $0x24] ss:$16 sps:$4 sm:$0xff]   ;;  %v3234_v59 = vld [vmem:[%s4136_s9 + $0x2c] ss:$16 sps:$4 sm:$0xff]  }
 0x1b4   : > { %v3236_v60 = vld [vmem:[%s4136_s9 + $0x20] ss:$16 sps:$4 sm:$0xff]   ;;  %v3237_v61 = vld [vmem:[%s4136_s9 + $0x28] ss:$16 sps:$4 sm:$0xff]   ;;  %v3238_v62 = vld [vmem:[%s4136_s9 + $0x4] ss:$16 sps:$4 sm:$0xff]  }
 0x1b5   : > { %v3240_v63 = vld [vmem:[%s4136_s9 + $0xc] ss:$16 sps:$4 sm:$0xff]   ;;  %v3242_v0 = vld [vmem:[%s4136_s9] ss:$16 sps:$4 sm:$0xff]   ;;  %v3243_v1 = vld [vmem:[%s4136_s9 + $0x8] ss:$16 sps:$4 sm:$0xff]  }
 0x1b6   : > { %1073 = vmatpush1.bf16.msra.mxu0 %v3212_v44  ;;  %1146 = vmatpush1.bf16.msra.mxu1 %v3213_v45  ;;  %v842_v2 = vld [vmem:[#allocation2 + $0x30] sm:$0xff]  ;;  %v843_v3 = vld [vmem:[#allocation2] sm:$0xff]  ;;  %v4225_v8 = vld [vmem:[%s4142_s21 + $0xe8] ss:$16 sps:$4 sm:$0xff]   ;;  %p2936_p13 = scmp.ne.s32.totalorder %s4980_s29, 1 }
 0x1b7   : > { %1074 = vmatprep.subr.bf16.mxu0 %v3214_v46  ;;  %1147 = vmatprep.subr.bf16.mxu1 %v3216_v47  ;;  %v4216_v4 = vld [vmem:[%s4142_s21 + $0xe4] ss:$16 sps:$4 sm:$0xff]   ;;  %v4219_v5 = vld [vmem:[%s4142_s21 + $0xec] ss:$16 sps:$4 sm:$0xff]   ;;  %v850_v6 = vpack.c.bf16 %v843_v3, %v842_v2  ;;  %v4222_v7 = vld [vmem:[%s4142_s21 + $0xe0] ss:$16 sps:$4 sm:$0xff]  }
 0x1b8   : > { %v4230_v9 = vld [vmem:[%s4142_s21 + $0xc4] ss:$16 sps:$4 sm:$0xff]   ;;  %v4233_v10 = vld [vmem:[%s4142_s21 + $0xcc] ss:$16 sps:$4 sm:$0xff]   ;;  %v4236_v11 = vld [vmem:[%s4142_s21 + $0xc0] ss:$16 sps:$4 sm:$0xff]  }
 0x1b9   : > { %v4239_v12 = vld [vmem:[%s4142_s21 + $0xc8] ss:$16 sps:$4 sm:$0xff]   ;;  %v845_v14 = vld [vmem:[#allocation2 + $0x10] sm:$0xff]  ;;  %v847_v25 = vld [vmem:[#allocation2 + $0x20] sm:$0xff] }
 0x1ba   : > { %1075 = vmatpush1.bf16.msra.mxu0 %v3218_v48  ;;  %1148 = vmatpush1.bf16.msra.mxu1 %v3219_v49  ;;  %v844_v13 = vld [vmem:[#allocation2 + $0x18] sm:$0xff]  ;;  %v4254_v18 = vld [vmem:[%s4142_s21 + $0xa0] ss:$16 sps:$4 sm:$0xff]   ;;  %v846_v24 = vld [vmem:[#allocation2 + $0x8] sm:$0xff]  ;;  %v888_v49 = vlaneseq }
 0x1bb   : > { %1076 = vmatprep.subr.bf16.mxu0 %v3220_v50  ;;  %1149 = vmatprep.subr.bf16.mxu1 %v3222_v51  ;;  %v4244_v15 = vld [vmem:[%s4142_s21 + $0xa4] ss:$16 sps:$4 sm:$0xff]   ;;  %v4249_v16 = vld [vmem:[%s4142_s21 + $0xac] ss:$16 sps:$4 sm:$0xff]   ;;  %v851_v17 = vpack.c.bf16 %v845_v14, %v844_v13  ;;  %v4257_v19 = vld [vmem:[%s4142_s21 + $0xa8] ss:$16 sps:$4 sm:$0xff]   ;;  %v852_v28 = vpack.c.bf16 %v847_v25, %v846_v24 }
 0x1bc   : > { %v4262_v20 = vld [vmem:[%s4142_s21 + $0x84] ss:$16 sps:$4 sm:$0xff]   ;;  %v4267_v21 = vld [vmem:[%s4142_s21 + $0x8c] ss:$16 sps:$4 sm:$0xff]   ;;  %v4270_v22 = vld [vmem:[%s4142_s21 + $0x80] ss:$16 sps:$4 sm:$0xff]  }
 0x1bd   : > { %v4273_v23 = vld [vmem:[%s4142_s21 + $0x88] ss:$16 sps:$4 sm:$0xff]   ;;  %v4280_v26 = vld [vmem:[%s4142_s21 + $0x64] ss:$16 sps:$4 sm:$0xff]   ;;  %v4283_v27 = vld [vmem:[%s4142_s21 + $0x6c] ss:$16 sps:$4 sm:$0xff]  }
 0x1be   : > { %1077 = vmatpush1.bf16.msra.mxu0 %v3224_v52  ;;  %1150 = vmatpush1.bf16.msra.mxu1 %v3225_v53  ;;  %v4290_v29 = vld [vmem:[%s4142_s21 + $0x60] ss:$16 sps:$4 sm:$0xff]   ;;  %v4293_v30 = vld [vmem:[%s4142_s21 + $0x68] ss:$16 sps:$4 sm:$0xff]   ;;  %v4298_v31 = vld [vmem:[%s4142_s21 + $0x44] ss:$16 sps:$4 sm:$0xff]  }
 0x1bf   : > { %1078 = vmatprep.subr.bf16.mxu0 %v3226_v54  ;;  %1151 = vmatprep.subr.bf16.mxu1 %v3228_v55  ;;  %v4301_v32 = vld [vmem:[%s4142_s21 + $0x4c] ss:$16 sps:$4 sm:$0xff]   ;;  %v4304_v33 = vld [vmem:[%s4142_s21 + $0x40] ss:$16 sps:$4 sm:$0xff]   ;;  %v4309_v34 = vld [vmem:[%s4142_s21 + $0x48] ss:$16 sps:$4 sm:$0xff]  }
 0x1c0   : > { %v848_v36 = vld [vmem:[#allocation2 + $0x28] sm:$0xff]  ;;  %v849_v37 = vld [vmem:[#allocation2 + $0x38] sm:$0xff]  ;;  %v4324_v41 = vld [vmem:[%s4142_s21 + $0x20] ss:$16 sps:$4 sm:$0xff]   ;;  %v889_v50 = vshrl.u32 %v888_v49, 7 }
 0x1c1   : > { %v4314_v38 = vld [vmem:[%s4142_s21 + $0x24] ss:$16 sps:$4 sm:$0xff]   ;;  %v4317_v39 = vld [vmem:[%s4142_s21 + $0x2c] ss:$16 sps:$4 sm:$0xff]   ;;  %v853_v40 = vpack.c.bf16 %v849_v37, %v848_v36  ;;  %v4327_v42 = vld [vmem:[%s4142_s21 + $0x28] ss:$16 sps:$4 sm:$0xff]  }
 0x1c2   : > { %1079 = vmatpush1.bf16.msra.mxu0 %v3230_v56  ;;  %1152 = vmatpush1.bf16.msra.mxu1 %v3231_v57  ;;  %v4332_v43 = vld [vmem:[%s4142_s21 + $0x4] ss:$16 sps:$4 sm:$0xff]   ;;  %v4335_v44 = vld [vmem:[%s4142_s21 + $0xc] ss:$16 sps:$4 sm:$0xff]   ;;  %v4340_v45 = vld [vmem:[%s4142_s21] ss:$16 sps:$4 sm:$0xff]  }
 0x1c3   : > { %1080 = vmatprep.subr.bf16.mxu0 %v3232_v58  ;;  %1153 = vmatprep.subr.bf16.mxu1 %v3234_v59  ;;  %v4343_v46 = vld [vmem:[%s4142_s21 + $0x8] ss:$16 sps:$4 sm:$0xff]   ;;  %v898_v51 = vsub.s32 2, %v889_v50  ;;  %v890_v52 = vsub.s32 0, %v889_v50  ;;  %v902_v53 = vsub.s32 3, %v889_v50  ;;  %v894_v58 = vsub.s32 1, %v889_v50 }
 0x1c4   : > { %v1278_v47 = vld [vmem:[%s601_s17] sm:$0xff]  ;;  %v886_v54 = vld [vmem:[%s4145_s18] sm:$0xf] }
 0x1c5   : > { %v1280_v48 = vpack.c.bf16 %v1278_v47, %v1278_v47  ;;  %v4394_v57 = vrot.slane %v886_v54, %v898_v51 }
 0x1c6   : > { %1081 = vmatpush1.bf16.msra.mxu0 %v3236_v60  ;;  %1154 = vmatpush1.bf16.msra.mxu1 %v3237_v61  ;;  %v891_v61 = vrot.slane %v886_v54, %v890_v52 }
 0x1c7   : > { %1082 = vmatprep.subr.bf16.mxu0 %v3238_v62  ;;  %1155 = vmatprep.subr.bf16.mxu1 %v3240_v63  ;;  %v4400_v62 = vrot.slane %v886_v54, %v902_v53 }
 0x1ca   : > { %1083 = vmatpush1.bf16.msra.mxu0 %v3242_v0  ;;  %1156 = vmatpush1.bf16.msra.mxu1 %v3243_v1  ;;  %v895_v1 = vrot.slane %v886_v54, %v894_v58 }
 0x1cb   : > { %1441 = vmatprep.subr.bf16.mxu0 %v4216_v4  ;;  %1482 = vmatprep.subr.bf16.mxu1 %v4219_v5 }
 0x1cd   : > { %1101 = vmatmul.mubr.bf16.vlgmr.msra.gmra.mxu0 %v850_v6  ;;  %1174 = vmatmul.mubr.bf16.vlgmr.msra.gmra.mxu1 %v850_v6 }
 0x1ce   : > { %1442 = vmatpush1.bf16.msra.mxu0 %v4222_v7  ;;  %1483 = vmatpush1.bf16.msra.mxu1 %v4225_v8 }
 0x1cf   : > { %1443 = vmatprep.subr.bf16.mxu0 %v4230_v9  ;;  %1484 = vmatprep.subr.bf16.mxu1 %v4233_v10 }
 0x1d0   : > { %1110 = vmatprep.mubr.bf16.mxu0 %v4900_v35  ;;  %1183 = vmatprep.mubr.bf16.mxu1 %v4900_v35 }
 0x1d2   : > { %1444 = vmatpush1.bf16.msra.mxu0 %v4236_v11  ;;  %1485 = vmatpush1.bf16.msra.mxu1 %v4239_v12 }
 0x1d3   : > { %1445 = vmatprep.subr.bf16.mxu0 %v4244_v15  ;;  %1486 = vmatprep.subr.bf16.mxu1 %v4249_v16 }
 0x1d5   : > { %1111 = vmatmul.mubr.bf16.gmra.mxu0 %v851_v17  ;;  %1184 = vmatmul.mubr.bf16.gmra.mxu1 %v851_v17 }
 0x1d6   : > { %1446 = vmatpush1.bf16.msra.mxu0 %v4254_v18  ;;  %1487 = vmatpush1.bf16.msra.mxu1 %v4257_v19 }
 0x1d7   : > { %1447 = vmatprep.subr.bf16.mxu0 %v4262_v20  ;;  %1488 = vmatprep.subr.bf16.mxu1 %v4267_v21 }
 0x1d8   : > { %1120 = vmatprep.mubr.bf16.mxu0 %v4900_v35  ;;  %1193 = vmatprep.mubr.bf16.mxu1 %v4900_v35 }
 0x1da   : > { %1448 = vmatpush1.bf16.msra.mxu0 %v4270_v22  ;;  %1489 = vmatpush1.bf16.msra.mxu1 %v4273_v23 }
 0x1db   : > { %1449 = vmatprep.subr.bf16.mxu0 %v4280_v26  ;;  %1490 = vmatprep.subr.bf16.mxu1 %v4283_v27 }
 0x1dd   : > { %1121 = vmatmul.mubr.bf16.gmra.mxu0 %v852_v28  ;;  %1194 = vmatmul.mubr.bf16.gmra.mxu1 %v852_v28 }
 0x1de   : > { %1450 = vmatpush1.bf16.msra.mxu0 %v4290_v29  ;;  %1491 = vmatpush1.bf16.msra.mxu1 %v4293_v30 }
 0x1df   : > { %1451 = vmatprep.subr.bf16.mxu0 %v4298_v31  ;;  %1492 = vmatprep.subr.bf16.mxu1 %v4301_v32 }
 0x1e0   : > { %1130 = vmatprep.mubr.bf16.mxu0 %v4900_v35  ;;  %1203 = vmatprep.mubr.bf16.mxu1 %v4900_v35 }
 0x1e2   : > { %1452 = vmatpush1.bf16.msra.mxu0 %v4304_v33  ;;  %1493 = vmatpush1.bf16.msra.mxu1 %v4309_v34 }
 0x1e3   : > { %1453 = vmatprep.subr.bf16.mxu0 %v4314_v38  ;;  %1494 = vmatprep.subr.bf16.mxu1 %v4317_v39 }
 0x1e5   : > { %1131 = vmatmul.mubr.bf16.gmra.mxu0 %v853_v40  ;;  %1204 = vmatmul.mubr.bf16.gmra.mxu1 %v853_v40 }
 0x1e6   : > { %1454 = vmatpush1.bf16.msra.mxu0 %v4324_v41  ;;  %1495 = vmatpush1.bf16.msra.mxu1 %v4327_v42 }
 0x1e7   : > { %1455 = vmatprep.subr.bf16.mxu0 %v4332_v43  ;;  %1496 = vmatprep.subr.bf16.mxu1 %v4335_v44 }
 0x1e8   : > { %1473 = vmatprep.mubr.bf16.mxu0 %v4900_v35  ;;  %1514 = vmatprep.mubr.bf16.mxu1 %v4900_v35 }
 0x1ea   : > { %1456 = vmatpush1.bf16.msra.mxu0 %v4340_v45  ;;  %1497 = vmatpush1.bf16.msra.mxu1 %v4343_v46 }
 0x1eb   : > { %1554 = vmatprep.subr.bf16.mxu0 %v4216_v4  ;;  %1595 = vmatprep.subr.bf16.mxu1 %v4219_v5 }
 0x1ed   : > { %1474 = vmatmul.mubr.bf16.vlgmr.msra.gmra.mxu0 %v1280_v48  ;;  %1515 = vmatmul.mubr.bf16.vlgmr.msra.gmra.mxu1 %v1280_v48 }
 0x1ee   : > { %1555 = vmatpush1.bf16.msra.mxu0 %v4222_v7  ;;  %1596 = vmatpush1.bf16.msra.mxu1 %v4225_v8 }
 0x1ef   : > { %1556 = vmatprep.subr.bf16.mxu0 %v4230_v9  ;;  %1597 = vmatprep.subr.bf16.mxu1 %v4233_v10 }
 0x1f0   : > { %1586 = vmatprep.mubr.bf16.mxu0 %v4900_v35  ;;  %1627 = vmatprep.mubr.bf16.mxu1 %v4900_v35 }
 0x1f2   : > { %1557 = vmatpush1.bf16.msra.mxu0 %v4236_v11  ;;  %1598 = vmatpush1.bf16.msra.mxu1 %v4239_v12 }
 0x1f3   : > { %1558 = vmatprep.subr.bf16.mxu0 %v4244_v15  ;;  %1599 = vmatprep.subr.bf16.mxu1 %v4249_v16 }
 0x1f6   : > { %1559 = vmatpush1.bf16.msra.mxu0 %v4254_v18  ;;  %1600 = vmatpush1.bf16.msra.mxu1 %v4257_v19 }
 0x1f7   : > { %1560 = vmatprep.subr.bf16.mxu0 %v4262_v20  ;;  %1601 = vmatprep.subr.bf16.mxu1 %v4267_v21 }
 0x1fa   : > { %1561 = vmatpush1.bf16.msra.mxu0 %v4270_v22  ;;  %1602 = vmatpush1.bf16.msra.mxu1 %v4273_v23 }
 0x1fb   : > { %1562 = vmatprep.subr.bf16.mxu0 %v4280_v26  ;;  %1603 = vmatprep.subr.bf16.mxu1 %v4283_v27 }
 0x1fe   : > { %1563 = vmatpush1.bf16.msra.mxu0 %v4290_v29  ;;  %1604 = vmatpush1.bf16.msra.mxu1 %v4293_v30 }
 0x1ff   : > { %1564 = vmatprep.subr.bf16.mxu0 %v4298_v31  ;;  %1605 = vmatprep.subr.bf16.mxu1 %v4301_v32 }
 0x202   : > { %1565 = vmatpush1.bf16.msra.mxu0 %v4304_v33  ;;  %1606 = vmatpush1.bf16.msra.mxu1 %v4309_v34 }
 0x203   : > { %1566 = vmatprep.subr.bf16.mxu0 %v4314_v38  ;;  %1607 = vmatprep.subr.bf16.mxu1 %v4317_v39 }
 0x206   : > { %1567 = vmatpush1.bf16.msra.mxu0 %v4324_v41  ;;  %1608 = vmatpush1.bf16.msra.mxu1 %v4327_v42 }
 0x207   : > { %1568 = vmatprep.subr.bf16.mxu0 %v4332_v43  ;;  %1609 = vmatprep.subr.bf16.mxu1 %v4335_v44 }
 0x20a   : > { %1569 = vmatpush1.bf16.msra.mxu0 %v4340_v45  ;;  %1610 = vmatpush1.bf16.msra.mxu1 %v4343_v46 }
 0x20b   : > { %1668 = vmatprep.subr.bf16.mxu0 %v4216_v4  ;;  %1709 = vmatprep.subr.bf16.mxu1 %v4219_v5 }
 0x28d   : > { %v4390_v55 = vpop.f32.mrf.mxu0  ;;  %v4392_v56 = vpop.f32.mrf.mxu1 }
 0x28f   : > { %v4396_v59 = vpop.f32.mrf.mxu0  ;;  %v4398_v60 = vpop.f32.mrf.mxu1 }
 0x291   : > { %v1106_v63 = vpop.f32.mrf.mxu0  ;;  %v1179_v0 = vpop.f32.mrf.mxu1 }
 0x292   : > { %v4402_v2 = vadd.f32 %v1106_v63, %v891_v61  ;;  %v4405_v3 = vadd.f32 %v1179_v0, %v4394_v57 }
 0x293   : > { %v1108_v6 = vpop.f32.mrf.mxu0  ;;  %v1181_v13 = vpop.f32.mrf.mxu1 }
 0x294   : > { %v4407_v14 = vadd.f32 %v1108_v6, %v895_v1  ;;  %v4410_v17 = vadd.f32 %v1181_v13, %v4400_v62 }
 0x295   : > { %v1112_v24 = vpop.f32.mrf.mxu0  ;;  %v1185_v25 = vpop.f32.mrf.mxu1 }
 0x296   : > { %v4412_v28 = vadd.f32 %v1112_v24, %v891_v61  ;;  %v4415_v36 = vadd.f32 %v1185_v25, %v4394_v57 }
 0x297   : > { %v1114_v37 = vpop.f32.mrf.mxu0  ;;  %v1187_v40 = vpop.f32.mrf.mxu1 }
 0x298   : > { %v4417_v47 = vadd.f32 %v1114_v37, %v895_v1  ;;  %v4420_v48 = vadd.f32 %v1187_v40, %v4400_v62 }
 0x299   : > { %v1116_v49 = vpop.f32.mrf.mxu0  ;;  %v1189_v50 = vpop.f32.mrf.mxu1 }
 0x29a   : > { %v4422_v51 = vadd.f32 %v1116_v49, %v891_v61  ;;  %v4425_v52 = vadd.f32 %v1189_v50, %v4394_v57 }
 0x29b   : > { %v1118_v53 = vpop.f32.mrf.mxu0  ;;  %v1191_v54 = vpop.f32.mrf.mxu1 }
 0x29c   : > { %4943 = vst [vmem:[#allocation39_spill] sm:$0xff] %v4422_v51  ;;  %4944 = vst [vmem:[#allocation40_spill] sm:$0xff] %v4425_v52  ;;  %v4427_v58 = vadd.f32 %v1118_v53, %v895_v1  ;;  %v4430_v63 = vadd.f32 %v1191_v54, %v4400_v62  ;;  %v1178_v51 = vadd.f32 %v4398_v60, %v4400_v62  ;;  %v1279_v60 = vld [vmem:[%s4172_s3] sm:$0xff] }
 0x29d   : > { %v1122_v0 = vpop.f32.mrf.mxu0  ;;  %v1195_v6 = vpop.f32.mrf.mxu1 }
 0x29e   : > { %4945 = vst [vmem:[#allocation41_spill] sm:$0xff] %v4427_v58  ;;  %4946 = vst [vmem:[#allocation42_spill] sm:$0xff] %v4430_v63  ;;  %v4432_v13 = vadd.f32 %v1122_v0, %v891_v61  ;;  %v4435_v24 = vadd.f32 %v1195_v6, %v4394_v57 }
 0x29f   : > { %v1124_v25 = vpop.f32.mrf.mxu0  ;;  %v1197_v37 = vpop.f32.mrf.mxu1 }
 0x2a0   : > { %4947 = vst [vmem:[#allocation43_spill] sm:$0xff] %v4432_v13  ;;  %4948 = vst [vmem:[#allocation44_spill] sm:$0xff] %v4435_v24  ;;  %v4437_v40 = vadd.f32 %v1124_v25, %v895_v1  ;;  %v4440_v49 = vadd.f32 %v1197_v37, %v4400_v62 }
 0x2a1   : > { %v1126_v50 = vpop.f32.mrf.mxu0  ;;  %v1199_v53 = vpop.f32.mrf.mxu1 }
 0x2a2   : > { %4949 = vst [vmem:[#allocation45_spill] sm:$0xff] %v4437_v40  ;;  %4950 = vst [vmem:[#allocation46_spill] sm:$0xff] %v4440_v49  ;;  %v4442_v35 = vadd.f32 %v1126_v50, %v891_v61  ;;  %v4445_v54 = vadd.f32 %v1199_v53, %v4394_v57 }
 0x2a3   : > { %v1128_v52 = vpop.f32.mrf.mxu0  ;;  %v1201_v0 = vpop.f32.mrf.mxu1 }
 0x2a4   : > { %4951 = vst [vmem:[#allocation47_spill] sm:$0xff] %v4442_v35  ;;  %4952 = vst [vmem:[#allocation48_spill] sm:$0xff] %v4445_v54  ;;  %v4447_v13 = vadd.f32 %v1128_v52, %v895_v1  ;;  %v4450_v6 = vadd.f32 %v1201_v0, %v4400_v62 }
 0x2a5   : > { %v1132_v24 = vpop.f32.mrf.mxu0  ;;  %v1205_v25 = vpop.f32.mrf.mxu1 }
 0x2a6   : > { %4953 = vst [vmem:[#allocation49_spill] sm:$0xff] %v4447_v13  ;;  %4954 = vst [vmem:[#allocation50_spill] sm:$0xff] %v4450_v6  ;;  %v4452_v40 = vadd.f32 %v1132_v24, %v891_v61  ;;  %v4455_v37 = vadd.f32 %v1205_v25, %v4394_v57 }
 0x2a7   : > { %v1134_v49 = vpop.f32.mrf.mxu0  ;;  %v1207_v50 = vpop.f32.mrf.mxu1 }
 0x2a8   : > { %4955 = vst [vmem:[#allocation51_spill] sm:$0xff] %v4452_v40  ;;  %4956 = vst [vmem:[#allocation52_spill] sm:$0xff] %v4455_v37  ;;  %v4457_v35 = vadd.f32 %v1134_v49, %v895_v1  ;;  %v4460_v53 = vadd.f32 %v1207_v50, %v4400_v62  ;;  %v1103_v40 = vadd.f32 %v4390_v55, %v891_v61 }
 0x2a9   : > { %v1136_v54 = vpop.f32.mrf.mxu0  ;;  %v1209_v52 = vpop.f32.mrf.mxu1  ;;  %v1105_v50 = vadd.f32 %v4396_v59, %v895_v1  ;;  %v1176_v59 = vadd.f32 %v4392_v56, %v4394_v57 }
 0x2aa   : > { %4957 = vst [vmem:[#allocation53_spill] sm:$0xff] %v4457_v35  ;;  %4958 = vst [vmem:[#allocation54_spill] sm:$0xff] %v4460_v53  ;;  %v4462_v13 = vadd.f32 %v1136_v54, %v891_v61  ;;  %v4465_v0 = vadd.f32 %v1209_v52, %v4394_v57 }
 0x2ab   : > { %v1138_v6 = vpop.f32.mrf.mxu0  ;;  %v1211_v24 = vpop.f32.mrf.mxu1 }
 0x2ac   : > { %4959 = vst [vmem:[#allocation55_spill] sm:$0xff] %v4462_v13  ;;  %4960 = vst [vmem:[#allocation56_spill] sm:$0xff] %v4465_v0  ;;  %v4468_v25 = vadd.f32 %v1138_v6, %v895_v1  ;;  %v4471_v37 = vadd.f32 %v1211_v24, %v4400_v62 }
 0x2ad   : > { %v1475_v49 = vpop.f32.mrf.mxu0  ;;  %v1516_v35 = vpop.f32.mrf.mxu1 }
 0x2ae   : > { %v1530_v53 = vadd.f32 %v1475_v49, %v1103_v40  ;;  %v1532_v1 = vadd.f32 %v1516_v35, %v1176_v59 }
 0x2af   : > { %v1477_v63 = vpop.f32.mrf.mxu0  ;;  %v1518_v54 = vpop.f32.mrf.mxu1 }
 0x2b0   : > { %v1534_v13 = vmul.f32 0.5, %v1530_v53  ;;  %v1531_v58 = vadd.f32 %v1477_v63, %v1105_v50  ;;  %v1533_v24 = vadd.f32 %v1518_v54, %v1178_v51  ;;  %v1536_v40 = vmul.f32 0.5, %v1532_v1 }
 0x2b1   : > { %v1479_v52 = vpop.f32.mrf.mxu0  ;;  %v1520_v0 = vpop.f32.mrf.mxu1 }
 0x2b2   : > { %3292 = vtanh.f32 %v1534_v13  ;;  %v1535_v55 = vmul.f32 0.5, %v1531_v58 }
 0x2b3   : > { %v1480_v61 = vpop.f32.mrf.mxu0  ;;  %v1521_v6 = vpop.f32.mrf.mxu1 }
 0x2b4   : > { %3294 = vtanh.f32 %v1535_v55  ;;  %v4961_v6 = vmov 0  }
 0x2b5   : > { %3296 = vtanh.f32 %v1533_v24 }
 0x2b6   : > { %3298 = vtanh.f32 %v1536_v40 }
 0x2bf   : > { %v3293_v53 = vpop.eup %3292 }
 0x2c0   : > { %v1540_v63 = vmul.f32 0.5, %v3293_v53 }
 0x2c1   : > { %v3295_v49 = vpop.eup %3294 }
 0x2c2   : > { %v1543_v0 = vadd.f32 0.5, %v1540_v63  ;;  %v1541_v50 = vmul.f32 0.5, %v3295_v49  ;;  %v3297_v13 = vpop.eup %3296 }
 0x2c3   : > { %v3299_v51 = vpop.eup %3298 }
 0x2c4   : > { %v1544_v62 = vadd.f32 0.5, %v1541_v50  ;;  %v1548_v52 = vmul.f32 %v3297_v13, %v1543_v0  ;;  %v1542_v56 = vmul.f32 0.5, %v3299_v51 }
 0x2c6   : > { %v1547_v58 = vmul.f32 %v1544_v62, %v1279_v60  ;;  %v1545_v57 = vadd.f32 0.5, %v1542_v56 }
 0x2c8   : > { %v4479_v61 = vadd.f32 %v1548_v52, %v1547_v58 }
 0x2ca   : > { %3300 = vtanh.f32 %v4479_v61 }
 0x2d7   : > { %v3301_v35 = vpop.eup %3300 }
 0x2d8   : > { %v1551_v54 = vmul.f32 %v3301_v35, %v1545_v57 }
 0x2da   : > { %1552 = vst [vmem:[#allocation2 + $0x30] sm:$0xff] %v1551_v54  ;;  %v1553_v55 = vpack.c.bf16 %v1551_v54, %v1551_v54 }
 0x2dc   : > { %1587 = vmatmul.mubr.bf16.vlgmr.msra.gmra.mxu0 %v1553_v55  ;;  %1628 = vmatmul.mubr.bf16.vlgmr.msra.gmra.mxu1 %v1553_v55 }
 0x2dd   : > { %1669 = vmatpush1.bf16.msra.mxu0 %v4222_v7  ;;  %1710 = vmatpush1.bf16.msra.mxu1 %v4225_v8 }
 0x2de   : > { %1670 = vmatprep.subr.bf16.mxu0 %v4230_v9  ;;  %1711 = vmatprep.subr.bf16.mxu1 %v4233_v10 }
 0x2df   : > { %1700 = vmatprep.mubr.bf16.mxu0 %v4961_v6  ;;  %1741 = vmatprep.mubr.bf16.mxu1 %v4961_v6 }
 0x2e1   : > { %1671 = vmatpush1.bf16.msra.mxu0 %v4236_v11  ;;  %1712 = vmatpush1.bf16.msra.mxu1 %v4239_v12 }
 0x2e2   : > { %1672 = vmatprep.subr.bf16.mxu0 %v4244_v15  ;;  %1713 = vmatprep.subr.bf16.mxu1 %v4249_v16 }
 0x2e5   : > { %1673 = vmatpush1.bf16.msra.mxu0 %v4254_v18  ;;  %1714 = vmatpush1.bf16.msra.mxu1 %v4257_v19 }
 0x2e6   : > { %1674 = vmatprep.subr.bf16.mxu0 %v4262_v20  ;;  %1715 = vmatprep.subr.bf16.mxu1 %v4267_v21 }
 0x2e9   : > { %1675 = vmatpush1.bf16.msra.mxu0 %v4270_v22  ;;  %1716 = vmatpush1.bf16.msra.mxu1 %v4273_v23 }
 0x2ea   : > { %1676 = vmatprep.subr.bf16.mxu0 %v4280_v26  ;;  %1717 = vmatprep.subr.bf16.mxu1 %v4283_v27 }
 0x2ed   : > { %1677 = vmatpush1.bf16.msra.mxu0 %v4290_v29  ;;  %1718 = vmatpush1.bf16.msra.mxu1 %v4293_v30 }
 0x2ee   : > { %1678 = vmatprep.subr.bf16.mxu0 %v4298_v31  ;;  %1719 = vmatprep.subr.bf16.mxu1 %v4301_v32 }
 0x2f1   : > { %1679 = vmatpush1.bf16.msra.mxu0 %v4304_v33  ;;  %1720 = vmatpush1.bf16.msra.mxu1 %v4309_v34 }
 0x2f2   : > { %1680 = vmatprep.subr.bf16.mxu0 %v4314_v38  ;;  %1721 = vmatprep.subr.bf16.mxu1 %v4317_v39 }
 0x2f5   : > { %1681 = vmatpush1.bf16.msra.mxu0 %v4324_v41  ;;  %1722 = vmatpush1.bf16.msra.mxu1 %v4327_v42 }
 0x2f6   : > { %1682 = vmatprep.subr.bf16.mxu0 %v4332_v43  ;;  %1723 = vmatprep.subr.bf16.mxu1 %v4335_v44 }
 0x2f9   : > { %1683 = vmatpush1.bf16.msra.mxu0 %v4340_v45  ;;  %1724 = vmatpush1.bf16.msra.mxu1 %v4343_v46 }
 0x2fa   : > { %1782 = vmatprep.subr.bf16.mxu0 %v4216_v4  ;;  %1823 = vmatprep.subr.bf16.mxu1 %v4219_v5 }
 0x39c   : > { %v1588_v24 = vpop.f32.mrf.mxu0  ;;  %v1629_v59 = vpop.f32.mrf.mxu1 }
 0x39d   : > { %v1643_v1 = vadd.f32 %v1588_v24, %v4402_v2  ;;  %v1645_v52 = vadd.f32 %v1629_v59, %v4405_v3 }
 0x39e   : > { %v1590_v40 = vpop.f32.mrf.mxu0  ;;  %v1631_v53 = vpop.f32.mrf.mxu1 }
 0x39f   : > { %v1647_v63 = vmul.f32 0.5, %v1643_v1  ;;  %v1644_v49 = vadd.f32 %v1590_v40, %v4407_v14  ;;  %v1646_v62 = vadd.f32 %v1631_v53, %v4410_v17  ;;  %v1649_v51 = vmul.f32 0.5, %v1645_v52 }
 0x3a0   : > { %v1592_v0 = vpop.f32.mrf.mxu0  ;;  %v1633_v50 = vpop.f32.mrf.mxu1 }
 0x3a1   : > { %3302 = vtanh.f32 %v1647_v63  ;;  %v1648_v60 = vmul.f32 0.5, %v1644_v49 }
 0x3a2   : > { %v1593_v13 = vpop.f32.mrf.mxu0  ;;  %v1634_v58 = vpop.f32.mrf.mxu1 }
 0x3a3   : > { %3304 = vtanh.f32 %v1648_v60 }
 0x3a4   : > { %3306 = vtanh.f32 %v1646_v62 }
 0x3a5   : > { %3308 = vtanh.f32 %v1649_v51 }
 0x3ae   : > { %v3303_v56 = vpop.eup %3302 }
 0x3af   : > { %v1653_v2 = vmul.f32 0.5, %v3303_v56 }
 0x3b0   : > { %v3305_v57 = vpop.eup %3304 }
 0x3b1   : > { %v1656_v35 = vadd.f32 0.5, %v1653_v2  ;;  %v1654_v54 = vmul.f32 0.5, %v3305_v57  ;;  %v3307_v14 = vpop.eup %3306 }
 0x3b2   : > { %v3309_v17 = vpop.eup %3308 }
 0x3b3   : > { %v1657_v55 = vadd.f32 0.5, %v1654_v54  ;;  %v1661_v24 = vmul.f32 %v3307_v14, %v1656_v35  ;;  %v1655_v53 = vmul.f32 0.5, %v3309_v17 }
 0x3b5   : > { %v1660_v1 = vmul.f32 %v1657_v55, %v4479_v61  ;;  %v1658_v63 = vadd.f32 0.5, %v1655_v53 }
 0x3b7   : > { %v4521_v40 = vadd.f32 %v1661_v24, %v1660_v1 }
 0x3b9   : > { %3310 = vtanh.f32 %v4521_v40 }
 0x3c6   : > { %v3311_v3 = vpop.eup %3310 }
 0x3c7   : > { %v1664_v59 = vmul.f32 %v3311_v3, %v1658_v63 }
 0x3c9   : > { %1666 = vst [vmem:[#allocation2] sm:$0xff] %v1664_v59  ;;  %v1667_v49 = vpack.c.bf16 %v1664_v59, %v1664_v59 }
 0x3cb   : > { %1701 = vmatmul.mubr.bf16.vlgmr.msra.gmra.mxu0 %v1667_v49  ;;  %1742 = vmatmul.mubr.bf16.vlgmr.msra.gmra.mxu1 %v1667_v49 }
 0x3cc   : > { %1783 = vmatpush1.bf16.msra.mxu0 %v4222_v7  ;;  %1824 = vmatpush1.bf16.msra.mxu1 %v4225_v8 }
 0x3cd   : > { %1784 = vmatprep.subr.bf16.mxu0 %v4230_v9  ;;  %1825 = vmatprep.subr.bf16.mxu1 %v4233_v10 }
 0x3ce   : > { %1814 = vmatprep.mubr.bf16.mxu0 %v4961_v6  ;;  %1855 = vmatprep.mubr.bf16.mxu1 %v4961_v6 }
 0x3d0   : > { %1785 = vmatpush1.bf16.msra.mxu0 %v4236_v11  ;;  %1826 = vmatpush1.bf16.msra.mxu1 %v4239_v12 }
 0x3d1   : > { %1786 = vmatprep.subr.bf16.mxu0 %v4244_v15  ;;  %1827 = vmatprep.subr.bf16.mxu1 %v4249_v16 }
 0x3d4   : > { %1787 = vmatpush1.bf16.msra.mxu0 %v4254_v18  ;;  %1828 = vmatpush1.bf16.msra.mxu1 %v4257_v19 }
 0x3d5   : > { %1788 = vmatprep.subr.bf16.mxu0 %v4262_v20  ;;  %1829 = vmatprep.subr.bf16.mxu1 %v4267_v21 }
 0x3d8   : > { %1789 = vmatpush1.bf16.msra.mxu0 %v4270_v22  ;;  %1830 = vmatpush1.bf16.msra.mxu1 %v4273_v23 }
 0x3d9   : > { %1790 = vmatprep.subr.bf16.mxu0 %v4280_v26  ;;  %1831 = vmatprep.subr.bf16.mxu1 %v4283_v27 }
 0x3dc   : > { %1791 = vmatpush1.bf16.msra.mxu0 %v4290_v29  ;;  %1832 = vmatpush1.bf16.msra.mxu1 %v4293_v30 }
 0x3dd   : > { %1792 = vmatprep.subr.bf16.mxu0 %v4298_v31  ;;  %1833 = vmatprep.subr.bf16.mxu1 %v4301_v32 }
 0x3e0   : > { %1793 = vmatpush1.bf16.msra.mxu0 %v4304_v33  ;;  %1834 = vmatpush1.bf16.msra.mxu1 %v4309_v34 }
 0x3e1   : > { %1794 = vmatprep.subr.bf16.mxu0 %v4314_v38  ;;  %1835 = vmatprep.subr.bf16.mxu1 %v4317_v39 }
 0x3e4   : > { %1795 = vmatpush1.bf16.msra.mxu0 %v4324_v41  ;;  %1836 = vmatpush1.bf16.msra.mxu1 %v4327_v42 }
 0x3e5   : > { %1796 = vmatprep.subr.bf16.mxu0 %v4332_v43  ;;  %1837 = vmatprep.subr.bf16.mxu1 %v4335_v44 }
 0x3e8   : > { %1797 = vmatpush1.bf16.msra.mxu0 %v4340_v45  ;;  %1838 = vmatpush1.bf16.msra.mxu1 %v4343_v46 }
 0x3e9   : > { %1896 = vmatprep.subr.bf16.mxu0 %v4216_v4  ;;  %1937 = vmatprep.subr.bf16.mxu1 %v4219_v5 }
 0x48b   : > { %v1702_v61 = vpop.f32.mrf.mxu0  ;;  %v1743_v0 = vpop.f32.mrf.mxu1 }
 0x48c   : > { %v1757_v50 = vadd.f32 %v1702_v61, %v4412_v28  ;;  %v1759_v54 = vadd.f32 %v1743_v0, %v4415_v36 }
 0x48d   : > { %v1704_v60 = vpop.f32.mrf.mxu0  ;;  %v1745_v62 = vpop.f32.mrf.mxu1 }
 0x48e   : > { %v1761_v13 = vmul.f32 0.5, %v1757_v50  ;;  %v1758_v58 = vadd.f32 %v1704_v60, %v4417_v47  ;;  %v1760_v2 = vadd.f32 %v1745_v62, %v4420_v48  ;;  %v1763_v14 = vmul.f32 0.5, %v1759_v54  ;;  %v4962_v62 = vld [vmem:[#allocation39_spill] sm:$0xff] }
 0x48f   : > { %v1706_v52 = vpop.f32.mrf.mxu0  ;;  %v1747_v51 = vpop.f32.mrf.mxu1 }
 0x490   : > { %3312 = vtanh.f32 %v1761_v13  ;;  %v1762_v56 = vmul.f32 0.5, %v1758_v58 }
 0x491   : > { %v1707_v57 = vpop.f32.mrf.mxu0  ;;  %v1748_v35 = vpop.f32.mrf.mxu1 }
 0x492   : > { %3314 = vtanh.f32 %v1762_v56  ;;  %v4963_v56 = vld [vmem:[#allocation41_spill] sm:$0xff] }
 0x493   : > { %3316 = vtanh.f32 %v1760_v2 }
 0x494   : > { %3318 = vtanh.f32 %v1763_v14  ;;  %v4964_v14 = vld [vmem:[#allocation42_spill] sm:$0xff] }
 0x49d   : > { %v3313_v55 = vpop.eup %3312 }
 0x49e   : > { %v1767_v28 = vmul.f32 0.5, %v3313_v55 }
 0x49f   : > { %v3315_v24 = vpop.eup %3314 }
 0x4a0   : > { %v1770_v1 = vadd.f32 0.5, %v1767_v28  ;;  %v1768_v17 = vmul.f32 0.5, %v3315_v24  ;;  %v3317_v47 = vpop.eup %3316 }
 0x4a1   : > { %v3319_v48 = vpop.eup %3318 }
 0x4a2   : > { %v1771_v53 = vadd.f32 0.5, %v1768_v17  ;;  %v1775_v63 = vmul.f32 %v3317_v47, %v1770_v1  ;;  %v1769_v49 = vmul.f32 0.5, %v3319_v48 }
 0x4a4   : > { %v1774_v3 = vmul.f32 %v1771_v53, %v4521_v40  ;;  %v1772_v61 = vadd.f32 0.5, %v1769_v49 }
 0x4a6   : > { %v4563_v59 = vadd.f32 %v1775_v63, %v1774_v3 }
 0x4a8   : > { %3320 = vtanh.f32 %v4563_v59 }
 0x4b5   : > { %v3321_v36 = vpop.eup %3320 }
 0x4b6   : > { %v1778_v0 = vmul.f32 %v3321_v36, %v1772_v61 }
 0x4b8   : > { %1780 = vst [vmem:[#allocation2 + $0x18] sm:$0xff] %v1778_v0  ;;  %v1781_v50 = vpack.c.bf16 %v1778_v0, %v1778_v0 }
 0x4ba   : > { %1815 = vmatmul.mubr.bf16.vlgmr.msra.gmra.mxu0 %v1781_v50  ;;  %1856 = vmatmul.mubr.bf16.vlgmr.msra.gmra.mxu1 %v1781_v50 }
 0x4bb   : > { %1897 = vmatpush1.bf16.msra.mxu0 %v4222_v7  ;;  %1938 = vmatpush1.bf16.msra.mxu1 %v4225_v8 }
 0x4bc   : > { %1898 = vmatprep.subr.bf16.mxu0 %v4230_v9  ;;  %1939 = vmatprep.subr.bf16.mxu1 %v4233_v10 }
 0x4bd   : > { %1928 = vmatprep.mubr.bf16.mxu0 %v4961_v6  ;;  %1969 = vmatprep.mubr.bf16.mxu1 %v4961_v6 }
 0x4bf   : > { %1899 = vmatpush1.bf16.msra.mxu0 %v4236_v11  ;;  %1940 = vmatpush1.bf16.msra.mxu1 %v4239_v12 }
 0x4c0   : > { %1900 = vmatprep.subr.bf16.mxu0 %v4244_v15  ;;  %1941 = vmatprep.subr.bf16.mxu1 %v4249_v16 }
 0x4c3   : > { %1901 = vmatpush1.bf16.msra.mxu0 %v4254_v18  ;;  %1942 = vmatpush1.bf16.msra.mxu1 %v4257_v19 }
 0x4c4   : > { %1902 = vmatprep.subr.bf16.mxu0 %v4262_v20  ;;  %1943 = vmatprep.subr.bf16.mxu1 %v4267_v21 }
 0x4c7   : > { %1903 = vmatpush1.bf16.msra.mxu0 %v4270_v22  ;;  %1944 = vmatpush1.bf16.msra.mxu1 %v4273_v23 }
 0x4c8   : > { %1904 = vmatprep.subr.bf16.mxu0 %v4280_v26  ;;  %1945 = vmatprep.subr.bf16.mxu1 %v4283_v27 }
 0x4cb   : > { %1905 = vmatpush1.bf16.msra.mxu0 %v4290_v29  ;;  %1946 = vmatpush1.bf16.msra.mxu1 %v4293_v30 }
 0x4cc   : > { %1906 = vmatprep.subr.bf16.mxu0 %v4298_v31  ;;  %1947 = vmatprep.subr.bf16.mxu1 %v4301_v32 }
 0x4cf   : > { %1907 = vmatpush1.bf16.msra.mxu0 %v4304_v33  ;;  %1948 = vmatpush1.bf16.msra.mxu1 %v4309_v34 }
 0x4d0   : > { %1908 = vmatprep.subr.bf16.mxu0 %v4314_v38  ;;  %1949 = vmatprep.subr.bf16.mxu1 %v4317_v39 }
 0x4d3   : > { %1909 = vmatpush1.bf16.msra.mxu0 %v4324_v41  ;;  %1950 = vmatpush1.bf16.msra.mxu1 %v4327_v42 }
 0x4d4   : > { %1910 = vmatprep.subr.bf16.mxu0 %v4332_v43  ;;  %1951 = vmatprep.subr.bf16.mxu1 %v4335_v44 }
 0x4d7   : > { %1911 = vmatpush1.bf16.msra.mxu0 %v4340_v45  ;;  %1952 = vmatpush1.bf16.msra.mxu1 %v4343_v46 }
 0x4d8   : > { %2010 = vmatprep.subr.bf16.mxu0 %v4216_v4  ;;  %2051 = vmatprep.subr.bf16.mxu1 %v4219_v5  ;;  %v4965_v4 = vld [vmem:[#allocation40_spill] sm:$0xff] }
 0x57a   : > { %v1816_v40 = vpop.f32.mrf.mxu0  ;;  %v1857_v60 = vpop.f32.mrf.mxu1 }
 0x57b   : > { %v1871_v13 = vadd.f32 %v1816_v40, %v4962_v62  ;;  %v1873_v5 = vadd.f32 %v1857_v60, %v4965_v4 }
 0x57c   : > { %v1818_v58 = vpop.f32.mrf.mxu0  ;;  %v1859_v52 = vpop.f32.mrf.mxu1 }
 0x57d   : > { %v1875_v51 = vmul.f32 0.5, %v1871_v13  ;;  %v1872_v2 = vadd.f32 %v1818_v58, %v4963_v56  ;;  %v1874_v55 = vadd.f32 %v1859_v52, %v4964_v14  ;;  %v1877_v1 = vmul.f32 0.5, %v1873_v5 }
 0x57e   : > { %v1820_v57 = vpop.f32.mrf.mxu0  ;;  %v1861_v35 = vpop.f32.mrf.mxu1 }
 0x57f   : > { %3322 = vtanh.f32 %v1875_v51  ;;  %v1876_v54 = vmul.f32 0.5, %v1872_v2  ;;  %v4969_v2 = vld [vmem:[#allocation44_spill] sm:$0xff] }
 0x580   : > { %v1821_v28 = vpop.f32.mrf.mxu0  ;;  %v1862_v24 = vpop.f32.mrf.mxu1 }
 0x581   : > { %3324 = vtanh.f32 %v1876_v54 }
 0x582   : > { %3326 = vtanh.f32 %v1874_v55 }
 0x583   : > { %3328 = vtanh.f32 %v1877_v1 }
 0x58c   : > { %v3323_v17 = vpop.eup %3322 }
 0x58d   : > { %v1881_v47 = vmul.f32 0.5, %v3323_v17 }
 0x58e   : > { %v3325_v53 = vpop.eup %3324 }
 0x58f   : > { %v1884_v63 = vadd.f32 0.5, %v1881_v47  ;;  %v1882_v3 = vmul.f32 0.5, %v3325_v53  ;;  %v3327_v48 = vpop.eup %3326 }
 0x590   : > { %v3329_v50 = vpop.eup %3328 }
 0x591   : > { %v1885_v49 = vadd.f32 0.5, %v1882_v3  ;;  %v1889_v61 = vmul.f32 %v3327_v48, %v1884_v63  ;;  %v1883_v40 = vmul.f32 0.5, %v3329_v50  ;;  %v4665_v50 = vld [vmem:[%s4142_s21 + $0xc4] ss:$16 sps:$4 sm:$0xff]  }
 0x593   : > { %v1888_v36 = vmul.f32 %v1885_v49, %v4563_v59  ;;  %v1886_v62 = vadd.f32 0.5, %v1883_v40  ;;  %v4968_v59 = vld [vmem:[#allocation46_spill] sm:$0xff]  ;;  %v4669_v40 = vld [vmem:[%s4142_s21 + $0xcc] ss:$16 sps:$4 sm:$0xff]  }
 0x595   : > { %v4605_v0 = vadd.f32 %v1889_v61, %v1888_v36  ;;  %v4657_v36 = vld [vmem:[%s4142_s21 + $0xe0] ss:$16 sps:$4 sm:$0xff]  }
 0x597   : > { %3330 = vtanh.f32 %v4605_v0 }
 0x5a4   : > { %v3331_v60 = vpop.eup %3330 }
 0x5a5   : > { %v1892_v13 = vmul.f32 %v3331_v60, %v1886_v62  ;;  %v4675_v62 = vld [vmem:[%s4142_s21 + $0xc0] ss:$16 sps:$4 sm:$0xff]   ;;  %v4679_v60 = vld [vmem:[%s4142_s21 + $0xc8] ss:$16 sps:$4 sm:$0xff]  }
 0x5a7   : > { %1894 = vst [vmem:[#allocation2 + $0x10] sm:$0xff] %v1892_v13  ;;  %v1895_v58 = vpack.c.bf16 %v1892_v13, %v1892_v13  ;;  %v4683_v13 = vld [vmem:[%s4142_s21 + $0xa4] ss:$16 sps:$4 sm:$0xff]  }
 0x5a9   : > { %1929 = vmatmul.mubr.bf16.vlgmr.msra.gmra.mxu0 %v1895_v58  ;;  %1970 = vmatmul.mubr.bf16.vlgmr.msra.gmra.mxu1 %v1895_v58  ;;  %v4687_v58 = vld [vmem:[%s4142_s21 + $0xac] ss:$16 sps:$4 sm:$0xff]  }
 0x5aa   : > { %2011 = vmatpush1.bf16.msra.mxu0 %v4222_v7  ;;  %2052 = vmatpush1.bf16.msra.mxu1 %v4225_v8  ;;  %v4641_v7 = vld [vmem:[%s4142_s21 + $0xe4] ss:$16 sps:$4 sm:$0xff]   ;;  %v4645_v8 = vld [vmem:[%s4142_s21 + $0xec] ss:$16 sps:$4 sm:$0xff]  }
 0x5ab   : > { %2012 = vmatprep.subr.bf16.mxu0 %v4230_v9  ;;  %2053 = vmatprep.subr.bf16.mxu1 %v4233_v10 }
 0x5ac   : > { %2042 = vmatprep.mubr.bf16.mxu0 %v4961_v6  ;;  %2083 = vmatprep.mubr.bf16.mxu1 %v4961_v6 }
 0x5ae   : > { %2013 = vmatpush1.bf16.msra.mxu0 %v4236_v11  ;;  %2054 = vmatpush1.bf16.msra.mxu1 %v4239_v12  ;;  %v4966_v11 = vld [vmem:[#allocation43_spill] sm:$0xff] }
 0x5af   : > { %2014 = vmatprep.subr.bf16.mxu0 %v4244_v15  ;;  %2055 = vmatprep.subr.bf16.mxu1 %v4249_v16 }
 0x5b2   : > { %2015 = vmatpush1.bf16.msra.mxu0 %v4254_v18  ;;  %2056 = vmatpush1.bf16.msra.mxu1 %v4257_v19  ;;  %v4967_v19 = vld [vmem:[#allocation45_spill] sm:$0xff] }
 0x5b3   : > { %2016 = vmatprep.subr.bf16.mxu0 %v4262_v20  ;;  %2057 = vmatprep.subr.bf16.mxu1 %v4267_v21 }
 0x5b6   : > { %2017 = vmatpush1.bf16.msra.mxu0 %v4270_v22  ;;  %2058 = vmatpush1.bf16.msra.mxu1 %v4273_v23 }
 0x5b7   : > { %2018 = vmatprep.subr.bf16.mxu0 %v4280_v26  ;;  %2059 = vmatprep.subr.bf16.mxu1 %v4283_v27 }
 0x5ba   : > { %2019 = vmatpush1.bf16.msra.mxu0 %v4290_v29  ;;  %2060 = vmatpush1.bf16.msra.mxu1 %v4293_v30 }
 0x5bb   : > { %2020 = vmatprep.subr.bf16.mxu0 %v4298_v31  ;;  %2061 = vmatprep.subr.bf16.mxu1 %v4301_v32 }
 0x5be   : > { %2021 = vmatpush1.bf16.msra.mxu0 %v4304_v33  ;;  %2062 = vmatpush1.bf16.msra.mxu1 %v4309_v34 }
 0x5bf   : > { %2022 = vmatprep.subr.bf16.mxu0 %v4314_v38  ;;  %2063 = vmatprep.subr.bf16.mxu1 %v4317_v39 }
 0x5c2   : > { %2023 = vmatpush1.bf16.msra.mxu0 %v4324_v41  ;;  %2064 = vmatpush1.bf16.msra.mxu1 %v4327_v42 }
 0x5c3   : > { %2024 = vmatprep.subr.bf16.mxu0 %v4332_v43  ;;  %2065 = vmatprep.subr.bf16.mxu1 %v4335_v44 }
 0x5c6   : > { %2025 = vmatpush1.bf16.msra.mxu0 %v4340_v45  ;;  %2066 = vmatpush1.bf16.msra.mxu1 %v4343_v46 }
 0x5c7   : > { %2124 = vmatprep.subr.bf16.mxu0 %v4641_v7  ;;  %2165 = vmatprep.subr.bf16.mxu1 %v4645_v8 }
 0x669   : > { %v1930_v9 = vpop.f32.mrf.mxu0  ;;  %v1971_v10 = vpop.f32.mrf.mxu1 }
 0x66a   : > { %v1985_v12 = vadd.f32 %v1930_v9, %v4966_v11  ;;  %v1987_v57 = vadd.f32 %v1971_v10, %v4969_v2  ;;  %v4691_v9 = vld [vmem:[%s4142_s21 + $0xa0] ss:$16 sps:$4 sm:$0xff]   ;;  %v4695_v10 = vld [vmem:[%s4142_s21 + $0xa8] ss:$16 sps:$4 sm:$0xff]   ;;  %v4699_v11 = vld [vmem:[%s4142_s21 + $0x84] ss:$16 sps:$4 sm:$0xff]  }
 0x66b   : > { %v1932_v15 = vpop.f32.mrf.mxu0  ;;  %v1973_v16 = vpop.f32.mrf.mxu1 }
 0x66c   : > { %v1989_v18 = vmul.f32 0.5, %v1985_v12  ;;  %v1986_v20 = vadd.f32 %v1932_v15, %v4967_v19  ;;  %v1988_v52 = vadd.f32 %v1973_v16, %v4968_v59  ;;  %v1991_v35 = vmul.f32 0.5, %v1987_v57  ;;  %v4703_v12 = vld [vmem:[%s4142_s21 + $0x8c] ss:$16 sps:$4 sm:$0xff]   ;;  %v4707_v15 = vld [vmem:[%s4142_s21 + $0x80] ss:$16 sps:$4 sm:$0xff]  }
 0x66d   : > { %v1934_v21 = vpop.f32.mrf.mxu0  ;;  %v1975_v22 = vpop.f32.mrf.mxu1  ;;  %v4711_v16 = vld [vmem:[%s4142_s21 + $0x88] ss:$16 sps:$4 sm:$0xff]  }
 0x66e   : > { %3332 = vtanh.f32 %v1989_v18  ;;  %v1990_v23 = vmul.f32 0.5, %v1986_v20 }
 0x66f   : > { %v1935_v51 = vpop.f32.mrf.mxu0  ;;  %v1976_v56 = vpop.f32.mrf.mxu1 }
 0x670   : > { %3334 = vtanh.f32 %v1990_v23 }
 0x671   : > { %3336 = vtanh.f32 %v1988_v52 }
 0x672   : > { %3338 = vtanh.f32 %v1991_v35 }
 0x67b   : > { %v3333_v54 = vpop.eup %3332 }
 0x67c   : > { %v1995_v14 = vmul.f32 0.5, %v3333_v54 }
 0x67d   : > { %v3335_v55 = vpop.eup %3334 }
 0x67e   : > { %v1998_v28 = vadd.f32 0.5, %v1995_v14  ;;  %v1996_v24 = vmul.f32 0.5, %v3335_v55  ;;  %v3337_v4 = vpop.eup %3336 }
 0x67f   : > { %v3339_v53 = vpop.eup %3338 }
 0x680   : > { %v1999_v5 = vadd.f32 0.5, %v1996_v24  ;;  %v2003_v1 = vmul.f32 %v3337_v4, %v1998_v28  ;;  %v1997_v63 = vmul.f32 0.5, %v3339_v53  ;;  %v3389_v24 = vld [vmem:[%s4142_s21 + $0x6c] ss:$16 sps:$4 sm:$0xff]   ;;  %v3390_v4 = vld [vmem:[%s4142_s21 + $0x60] ss:$16 sps:$4 sm:$0xff]  }
 0x681   : > { %v3395_v53 = vld [vmem:[%s4142_s21 + $0x48] ss:$16 sps:$4 sm:$0xff]  }
 0x682   : > { %v2002_v17 = vmul.f32 %v1999_v5, %v4605_v0  ;;  %v2000_v3 = vadd.f32 0.5, %v1997_v63  ;;  %v4661_v0 = vld [vmem:[%s4142_s21 + $0xe8] ss:$16 sps:$4 sm:$0xff]   ;;  %v3396_v63 = vld [vmem:[%s4142_s21 + $0x24] ss:$16 sps:$4 sm:$0xff]  }
 0x683   : > { %v3391_v5 = vld [vmem:[%s4142_s21 + $0x68] ss:$16 sps:$4 sm:$0xff]  }
 0x684   : > { %v4653_v47 = vadd.f32 %v2003_v1, %v2002_v17  ;;  %v3392_v1 = vld [vmem:[%s4142_s21 + $0x44] ss:$16 sps:$4 sm:$0xff]   ;;  %v3393_v17 = vld [vmem:[%s4142_s21 + $0x4c] ss:$16 sps:$4 sm:$0xff]  }
 0x686   : > { %3340 = vtanh.f32 %v4653_v47 }
 0x693   : > { %v3341_v48 = vpop.eup %3340 }
 0x694   : > { %v2006_v49 = vmul.f32 %v3341_v48, %v2000_v3  ;;  %v3397_v3 = vld [vmem:[%s4142_s21 + $0x2c] ss:$16 sps:$4 sm:$0xff]   ;;  %v3398_v48 = vld [vmem:[%s4142_s21 + $0x20] ss:$16 sps:$4 sm:$0xff]  }
 0x696   : > { %2008 = vst [vmem:[#allocation2 + $0x8] sm:$0xff] %v2006_v49  ;;  %v2009_v61 = vpack.c.bf16 %v2006_v49, %v2006_v49  ;;  %v3399_v49 = vld [vmem:[%s4142_s21 + $0x28] ss:$16 sps:$4 sm:$0xff]  }
 0x698   : > { %2043 = vmatmul.mubr.bf16.vlgmr.msra.gmra.mxu0 %v2009_v61  ;;  %2084 = vmatmul.mubr.bf16.vlgmr.msra.gmra.mxu1 %v2009_v61  ;;  %v3400_v61 = vld [vmem:[%s4142_s21 + $0x4] ss:$16 sps:$4 sm:$0xff]  }
 0x699   : > { %2125 = vmatpush1.bf16.msra.mxu0 %v4657_v36  ;;  %2166 = vmatpush1.bf16.msra.mxu1 %v4661_v0 }
 0x69a   : > { %2126 = vmatprep.subr.bf16.mxu0 %v4665_v50  ;;  %2167 = vmatprep.subr.bf16.mxu1 %v4669_v40 }
 0x69b   : > { %2156 = vmatprep.mubr.bf16.mxu0 %v4961_v6  ;;  %2197 = vmatprep.mubr.bf16.mxu1 %v4961_v6 }
 0x69d   : > { %2127 = vmatpush1.bf16.msra.mxu0 %v4675_v62  ;;  %2168 = vmatpush1.bf16.msra.mxu1 %v4679_v60 }
 0x69e   : > { %2128 = vmatprep.subr.bf16.mxu0 %v4683_v13  ;;  %2169 = vmatprep.subr.bf16.mxu1 %v4687_v58 }
 0x6a1   : > { %2129 = vmatpush1.bf16.msra.mxu0 %v4691_v9  ;;  %2170 = vmatpush1.bf16.msra.mxu1 %v4695_v10 }
 0x6a2   : > { %2130 = vmatprep.subr.bf16.mxu0 %v4699_v11  ;;  %2171 = vmatprep.subr.bf16.mxu1 %v4703_v12 }
 0x6a5   : > { %2131 = vmatpush1.bf16.msra.mxu0 %v4707_v15  ;;  %2172 = vmatpush1.bf16.msra.mxu1 %v4711_v16 }
 0x6a6   : > { %2132 = vmatprep.subr.bf16.mxu0 %v4280_v26  ;;  %2173 = vmatprep.subr.bf16.mxu1 %v4283_v27 }
 0x6a9   : > { %2133 = vmatpush1.bf16.msra.mxu0 %v4290_v29  ;;  %2174 = vmatpush1.bf16.msra.mxu1 %v4293_v30  ;;  %v4970_v29 = vld [vmem:[#allocation47_spill] sm:$0xff] }
 0x6aa   : > { %2134 = vmatprep.subr.bf16.mxu0 %v4298_v31  ;;  %2175 = vmatprep.subr.bf16.mxu1 %v4301_v32 }
 0x6ad   : > { %2135 = vmatpush1.bf16.msra.mxu0 %v4304_v33  ;;  %2176 = vmatpush1.bf16.msra.mxu1 %v4309_v34  ;;  %v4971_v34 = vld [vmem:[#allocation49_spill] sm:$0xff] }
 0x6ae   : > { %2136 = vmatprep.subr.bf16.mxu0 %v4314_v38  ;;  %2177 = vmatprep.subr.bf16.mxu1 %v4317_v39 }
 0x6b1   : > { %2137 = vmatpush1.bf16.msra.mxu0 %v4324_v41  ;;  %2178 = vmatpush1.bf16.msra.mxu1 %v4327_v42 }
 0x6b2   : > { %2138 = vmatprep.subr.bf16.mxu0 %v4332_v43  ;;  %2179 = vmatprep.subr.bf16.mxu1 %v4335_v44  ;;  %v4972_v43 = vld [vmem:[#allocation50_spill] sm:$0xff] }
 0x6b5   : > { %2139 = vmatpush1.bf16.msra.mxu0 %v4340_v45  ;;  %2180 = vmatpush1.bf16.msra.mxu1 %v4343_v46 }
 0x6b6   : > { %2238 = vmatprep.subr.bf16.mxu0 %v4641_v7  ;;  %2279 = vmatprep.subr.bf16.mxu1 %v4645_v8  ;;  %v4973_v7 = vld [vmem:[#allocation48_spill] sm:$0xff] }
 0x758   : > { %v2044_v26 = vpop.f32.mrf.mxu0  ;;  %v2085_v27 = vpop.f32.mrf.mxu1 }
 0x759   : > { %v2099_v30 = vadd.f32 %v2044_v26, %v4970_v29  ;;  %v2101_v8 = vadd.f32 %v2085_v27, %v4973_v7  ;;  %v4976_v27 = vld [vmem:[#allocation54_spill] sm:$0xff] }
 0x75a   : > { %v2046_v31 = vpop.f32.mrf.mxu0  ;;  %v2087_v32 = vpop.f32.mrf.mxu1 }
 0x75b   : > { %v2103_v33 = vmul.f32 0.5, %v2099_v30  ;;  %v2100_v38 = vadd.f32 %v2046_v31, %v4971_v34  ;;  %v2102_v44 = vadd.f32 %v2087_v32, %v4972_v43  ;;  %v2105_v18 = vmul.f32 0.5, %v2101_v8  ;;  %v4977_v32 = vld [vmem:[#allocation52_spill] sm:$0xff] }
 0x75c   : > { %v2048_v39 = vpop.f32.mrf.mxu0  ;;  %v2089_v41 = vpop.f32.mrf.mxu1 }
 0x75d   : > { %3342 = vtanh.f32 %v2103_v33  ;;  %v2104_v42 = vmul.f32 0.5, %v2100_v38 }
 0x75e   : > { %v2049_v45 = vpop.f32.mrf.mxu0  ;;  %v2090_v46 = vpop.f32.mrf.mxu1 }
 0x75f   : > { %3344 = vtanh.f32 %v2104_v42 }
 0x760   : > { %3346 = vtanh.f32 %v2102_v44 }
 0x761   : > { %3348 = vtanh.f32 %v2105_v18 }
 0x76a   : > { %v3343_v19 = vpop.eup %3342 }
 0x76b   : > { %v2109_v20 = vmul.f32 0.5, %v3343_v19 }
 0x76c   : > { %v3345_v21 = vpop.eup %3344 }
 0x76d   : > { %v2112_v22 = vadd.f32 0.5, %v2109_v20  ;;  %v2110_v23 = vmul.f32 0.5, %v3345_v21  ;;  %v3347_v59 = vpop.eup %3346 }
 0x76e   : > { %v3349_v57 = vpop.eup %3348 }
 0x76f   : > { %v2113_v52 = vadd.f32 0.5, %v2110_v23  ;;  %v2117_v51 = vmul.f32 %v3347_v59, %v2112_v22  ;;  %v2111_v35 = vmul.f32 0.5, %v3349_v57 }
 0x771   : > { %v2116_v56 = vmul.f32 %v2113_v52, %v4653_v47  ;;  %v2114_v54 = vadd.f32 0.5, %v2111_v35  ;;  %v3394_v47 = vld [vmem:[%s4142_s21 + $0x40] ss:$16 sps:$4 sm:$0xff]  }
 0x773   : > { %v4737_v2 = vadd.f32 %v2117_v51, %v2116_v56  ;;  %v4978_v51 = vld [vmem:[#allocation55_spill] sm:$0xff] }
 0x775   : > { %3350 = vtanh.f32 %v4737_v2 }
 0x782   : > { %v3351_v14 = vpop.eup %3350 }
 0x783   : > { %v2120_v55 = vmul.f32 %v3351_v14, %v2114_v54 }
 0x785   : > { %2122 = vst [vmem:[#allocation2 + $0x20] sm:$0xff] %v2120_v55  ;;  %v2123_v28 = vpack.c.bf16 %v2120_v55, %v2120_v55 }
 0x787   : > { %2157 = vmatmul.mubr.bf16.vlgmr.msra.gmra.mxu0 %v2123_v28  ;;  %2198 = vmatmul.mubr.bf16.vlgmr.msra.gmra.mxu1 %v2123_v28 }
 0x788   : > { %2239 = vmatpush1.bf16.msra.mxu0 %v4657_v36  ;;  %2280 = vmatpush1.bf16.msra.mxu1 %v4661_v0  ;;  %v3401_v36 = vld [vmem:[%s4142_s21 + $0xc] ss:$16 sps:$4 sm:$0xff]   ;;  %v3402_v0 = vld [vmem:[%s4142_s21] ss:$16 sps:$4 sm:$0xff]  }
 0x789   : > { %2240 = vmatprep.subr.bf16.mxu0 %v4665_v50  ;;  %2281 = vmatprep.subr.bf16.mxu1 %v4669_v40  ;;  %v3403_v50 = vld [vmem:[%s4142_s21 + $0x8] ss:$16 sps:$4 sm:$0xff]  }
 0x78a   : > { %2270 = vmatprep.mubr.bf16.mxu0 %v4961_v6  ;;  %2311 = vmatprep.mubr.bf16.mxu1 %v4961_v6  ;;  %v3388_v6 = vld [vmem:[%s4142_s21 + $0x64] ss:$16 sps:$4 sm:$0xff]  }
 0x78c   : > { %2241 = vmatpush1.bf16.msra.mxu0 %v4675_v62  ;;  %2282 = vmatpush1.bf16.msra.mxu1 %v4679_v60  ;;  %v4974_v60 = vld [vmem:[#allocation51_spill] sm:$0xff] }
 0x78d   : > { %2242 = vmatprep.subr.bf16.mxu0 %v4683_v13  ;;  %2283 = vmatprep.subr.bf16.mxu1 %v4687_v58 }
 0x790   : > { %2243 = vmatpush1.bf16.msra.mxu0 %v4691_v9  ;;  %2284 = vmatpush1.bf16.msra.mxu1 %v4695_v10 }
 0x791   : > { %2244 = vmatprep.subr.bf16.mxu0 %v4699_v11  ;;  %2285 = vmatprep.subr.bf16.mxu1 %v4703_v12  ;;  %v4975_v11 = vld [vmem:[#allocation53_spill] sm:$0xff] }
 0x794   : > { %2245 = vmatpush1.bf16.msra.mxu0 %v4707_v15  ;;  %2286 = vmatpush1.bf16.msra.mxu1 %v4711_v16 }
 0x795   : > { %2246 = vmatprep.subr.bf16.mxu0 %v3388_v6  ;;  %2287 = vmatprep.subr.bf16.mxu1 %v3389_v24 }
 0x798   : > { %2247 = vmatpush1.bf16.msra.mxu0 %v3390_v4  ;;  %2288 = vmatpush1.bf16.msra.mxu1 %v3391_v5  ;;  %v4979_v5 = vld [vmem:[#allocation56_spill] sm:$0xff] }
 0x799   : > { %2248 = vmatprep.subr.bf16.mxu0 %v3392_v1  ;;  %2289 = vmatprep.subr.bf16.mxu1 %v3393_v17 }
 0x79c   : > { %2249 = vmatpush1.bf16.msra.mxu0 %v3394_v47  ;;  %2290 = vmatpush1.bf16.msra.mxu1 %v3395_v53 }
 0x79d   : > { %2250 = vmatprep.subr.bf16.mxu0 %v3396_v63  ;;  %2291 = vmatprep.subr.bf16.mxu1 %v3397_v3 }
 0x7a0   : > { %2251 = vmatpush1.bf16.msra.mxu0 %v3398_v48  ;;  %2292 = vmatpush1.bf16.msra.mxu1 %v3399_v49 }
 0x7a1   : > { %2252 = vmatprep.subr.bf16.mxu0 %v3400_v61  ;;  %2293 = vmatprep.subr.bf16.mxu1 %v3401_v36 }
 0x7a4   : > { %2253 = vmatpush1.bf16.msra.mxu0 %v3402_v0  ;;  %2294 = vmatpush1.bf16.msra.mxu1 %v3403_v50 }
 0x847   : > { %v2158_v40 = vpop.f32.mrf.mxu0  ;;  %v2199_v62 = vpop.f32.mrf.mxu1 }
 0x848   : > { %v2213_v13 = vadd.f32 %v2158_v40, %v4974_v60  ;;  %v2215_v33 = vadd.f32 %v2199_v62, %v4977_v32 }
 0x849   : > { %v2160_v58 = vpop.f32.mrf.mxu0  ;;  %v2201_v9 = vpop.f32.mrf.mxu1 }
 0x84a   : > { %v2217_v10 = vmul.f32 0.5, %v2213_v13  ;;  %v2214_v12 = vadd.f32 %v2160_v58, %v4975_v11  ;;  %v2216_v29 = vadd.f32 %v2201_v9, %v4976_v27  ;;  %v2219_v34 = vmul.f32 0.5, %v2215_v33 }
 0x84b   : > { %v2162_v15 = vpop.f32.mrf.mxu0  ;;  %v2203_v16 = vpop.f32.mrf.mxu1 }
 0x84c   : > { %3352 = vtanh.f32 %v2217_v10  ;;  %v2218_v26 = vmul.f32 0.5, %v2214_v12 }
 0x84d   : > { %v2163_v30 = vpop.f32.mrf.mxu0  ;;  %v2204_v31 = vpop.f32.mrf.mxu1 }
 0x84e   : > { %3354 = vtanh.f32 %v2218_v26 }
 0x84f   : > { %3356 = vtanh.f32 %v2216_v29 }
 0x850   : > { %3358 = vtanh.f32 %v2219_v34 }
 0x859   : > { %v3353_v38 = vpop.eup %3352 }
 0x85a   : > { %v2223_v39 = vmul.f32 0.5, %v3353_v38 }
 0x85b   : > { %v3355_v41 = vpop.eup %3354 }
 0x85c   : > { %v2226_v42 = vadd.f32 0.5, %v2223_v39  ;;  %v2224_v43 = vmul.f32 0.5, %v3355_v41  ;;  %v3357_v44 = vpop.eup %3356 }
 0x85d   : > { %v3359_v18 = vpop.eup %3358 }
 0x85e   : > { %v2227_v45 = vadd.f32 0.5, %v2224_v43  ;;  %v2231_v46 = vmul.f32 %v3357_v44, %v2226_v42  ;;  %v2225_v19 = vmul.f32 0.5, %v3359_v18 }
 0x860   : > { %v2230_v7 = vmul.f32 %v2227_v45, %v4737_v2  ;;  %v2228_v20 = vadd.f32 0.5, %v2225_v19 }
 0x862   : > { %v2232_v8 = vadd.f32 %v2231_v46, %v2230_v7 }
 0x864   : > { %3360 = vtanh.f32 %v2232_v8 }
 0x871   : > { %v3361_v21 = vpop.eup %3360 }
 0x872   : > { %v2234_v22 = vmul.f32 %v3361_v21, %v2228_v20 }
 0x874   : > { %2236 = vst [vmem:[#allocation2 + $0x28] sm:$0xff] %v2234_v22  ;;  %v2237_v23 = vpack.c.bf16 %v2234_v22, %v2234_v22 }
 0x876   : > { %2271 = vmatmul.mubr.bf16.vlgmr.msra.gmra.mxu0 %v2237_v23  ;;  %2312 = vmatmul.mubr.bf16.vlgmr.msra.gmra.mxu1 %v2237_v23 }
 0x936   : > { %v2272_v59 = vpop.f32.mrf.mxu0  ;;  %v2313_v52 = vpop.f32.mrf.mxu1 }
 0x937   : > { %v2327_v56 = vadd.f32 %v2272_v59, %v4978_v51  ;;  %v2329_v1 = vadd.f32 %v2313_v52, %v4979_v5 }
 0x938   : > { %v2274_v57 = vpop.f32.mrf.mxu0  ;;  %v2315_v35 = vpop.f32.mrf.mxu1 }
 0x939   : > { %v2331_v54 = vmul.f32 0.5, %v2327_v56  ;;  %v2328_v2 = vadd.f32 %v2274_v57, %v4468_v25  ;;  %v2330_v6 = vadd.f32 %v2315_v35, %v4471_v37  ;;  %v2333_v17 = vmul.f32 0.5, %v2329_v1 }
 0x93a   : > { %v2276_v14 = vpop.f32.mrf.mxu0  ;;  %v2317_v55 = vpop.f32.mrf.mxu1 }
 0x93b   : > { %3362 = vtanh.f32 %v2331_v54  ;;  %v2332_v28 = vmul.f32 0.5, %v2328_v2 }
 0x93c   : > { %v2277_v24 = vpop.f32.mrf.mxu0  ;;  %v2318_v4 = vpop.f32.mrf.mxu1 }
 0x93d   : > { %3364 = vtanh.f32 %v2332_v28 }
 0x93e   : > { %3366 = vtanh.f32 %v2330_v6 }
 0x93f   : > { %3368 = vtanh.f32 %v2333_v17 }
 0x948   : > { %v3363_v47 = vpop.eup %3362 }
 0x949   : > { %v2337_v53 = vmul.f32 0.5, %v3363_v47 }
 0x94a   : > { %v3365_v63 = vpop.eup %3364 }
 0x94b   : > { %v2340_v3 = vadd.f32 0.5, %v2337_v53  ;;  %v2338_v25 = vmul.f32 0.5, %v3365_v63  ;;  %v3367_v48 = vpop.eup %3366 }
 0x94c   : > { %v3369_v0 = vpop.eup %3368 }
 0x94d   : > { %v2341_v49 = vadd.f32 0.5, %v2338_v25  ;;  %v2345_v61 = vmul.f32 %v3367_v48, %v2340_v3  ;;  %v2339_v50 = vmul.f32 0.5, %v3369_v0 }
 0x94f   : > { %v2344_v36 = vmul.f32 %v2341_v49, %v2232_v8  ;;  %v2342_v40 = vadd.f32 0.5, %v2339_v50 }
 0x951   : > { %v2346_v37 = vadd.f32 %v2345_v61, %v2344_v36 }
 0x953   : > { %3370 = vtanh.f32 %v2346_v37  ;;  %2352 = vst [vmem:[%s668_s1] sm:$0xff] %v2346_v37 }
 0x95f   : > { %2356 = sbr.rel (%p2936_p13) target bundleno = 2639 (0xa4f), region = 104 }
 0x960   : > { %v3371_v62 = vpop.eup %3370 }
 0x961   : > { %v2348_v60 = vmul.f32 %v3371_v62, %v2342_v40 }
 0x963   : > { %2350 = vst [vmem:[#allocation2 + $0x38] sm:$0xff] %v2348_v60  ;;  %2351 = vst [vmem:[%s661_s11] sm:$0xff] %v2348_v60 }
 0x964   : > { %v3404_v13 = vld [vmem:[#allocation15 + $0x38] sm:$0xff]   ;;  %v3405_v58 = vld [vmem:[#allocation15 + $0x30] sm:$0xff]   ;;  %v3406_v9 = vld [vmem:[#allocation15 + $0x28] sm:$0xff]  }
 0x965   : > { %2993 = vmatprep.subr.bf16.mxu0 %v3404_v13  ;;  %3025 = vmatprep.subr.bf16.mxu1 %v3404_v13  ;;  %v3407_v10 = vld [vmem:[#allocation15 + $0x20] sm:$0xff]   ;;  %v2358_v12 = vld [vmem:[#allocation2] sm:$0xff]  ;;  %v3410_v31 = vld [vmem:[#allocation15 + $0x8] sm:$0xff]  }
 0x966   : > { %2994 = vmatpush3.bf16.msra.mxu0 %v3404_v13  ;;  %3033 = vmatpush3.bf16.msra.mxu1 %v3404_v13  ;;  %v2357_v11 = vld [vmem:[#allocation2 + $0x30] sm:$0xff]  ;;  %v2361_v15 = vld [vmem:[#allocation2 + $0x8] sm:$0xff]  ;;  %v2362_v26 = vld [vmem:[#allocation2 + $0x20] sm:$0xff] }
 0x967   : > { %2995 = vmatprep.subr.bf16.mxu0 %v3405_v58  ;;  %3026 = vmatprep.subr.bf16.mxu1 %v3405_v58  ;;  %v2365_v16 = vpack.c.bf16 %v2358_v12, %v2357_v11  ;;  %v2367_v27 = vpack.c.bf16 %v2362_v26, %v2361_v15  ;;  %v3408_v29 = vld [vmem:[#allocation15 + $0x18] sm:$0xff]   ;;  %v3409_v30 = vld [vmem:[#allocation15 + $0x10] sm:$0xff]   ;;  %v3411_v32 = vld [vmem:[#allocation15] sm:$0xff]  }
 0x968   : > { %v2359_v33 = vld [vmem:[#allocation2 + $0x18] sm:$0xff]  ;;  %v2360_v34 = vld [vmem:[#allocation2 + $0x10] sm:$0xff]  ;;  %v2363_v38 = vld [vmem:[#allocation2 + $0x28] sm:$0xff] }
 0x969   : > { %3009 = vmatprep.mubr.bf16.mxu0 %v2365_v16  ;;  %3013 = vmatprep.mubr.bf16.mxu1 %v2367_v27  ;;  %v2366_v41 = vpack.c.bf16 %v2360_v34, %v2359_v33  ;;  %v2937_v43 = vld [vmem:[#allocation16] ss:$0 sm:$0xff] }
 0x96a   : > { %2996 = vmatpush3.bf16.msra.mxu0 %v3405_v58  ;;  %3034 = vmatpush3.bf16.msra.mxu1 %v3405_v58  ;;  %v2364_v39 = vld [vmem:[#allocation2 + $0x38] sm:$0xff] }
 0x96b   : > { %2997 = vmatprep.subr.bf16.mxu0 %v3406_v9  ;;  %3027 = vmatprep.subr.bf16.mxu1 %v3406_v9  ;;  %v2368_v42 = vpack.c.bf16 %v2364_v39, %v2363_v38 }
 0x96e   : > { %2998 = vmatpush3.bf16.msra.mxu0 %v3406_v9  ;;  %3035 = vmatpush3.bf16.msra.mxu1 %v3406_v9 }
 0x96f   : > { %2999 = vmatprep.subr.bf16.mxu0 %v3407_v10  ;;  %3028 = vmatprep.subr.bf16.mxu1 %v3407_v10 }
 0x972   : > { %3000 = vmatpush3.bf16.msra.mxu0 %v3407_v10  ;;  %3036 = vmatpush3.bf16.msra.mxu1 %v3407_v10 }
 0x973   : > { %3001 = vmatprep.subr.bf16.mxu0 %v3408_v29  ;;  %3029 = vmatprep.subr.bf16.mxu1 %v3408_v29 }
 0x976   : > { %3002 = vmatpush3.bf16.msra.mxu0 %v3408_v29  ;;  %3037 = vmatpush3.bf16.msra.mxu1 %v3408_v29 }
 0x977   : > { %3003 = vmatprep.subr.bf16.mxu0 %v3409_v30  ;;  %3030 = vmatprep.subr.bf16.mxu1 %v3409_v30 }
 0x97a   : > { %3004 = vmatpush3.bf16.msra.mxu0 %v3409_v30  ;;  %3038 = vmatpush3.bf16.msra.mxu1 %v3409_v30 }
 0x97b   : > { %3005 = vmatprep.subr.bf16.mxu0 %v3410_v31  ;;  %3031 = vmatprep.subr.bf16.mxu1 %v3410_v31 }
 0x97e   : > { %3006 = vmatpush3.bf16.msra.mxu0 %v3410_v31  ;;  %3039 = vmatpush3.bf16.msra.mxu1 %v3410_v31 }
 0x97f   : > { %3007 = vmatprep.subr.bf16.mxu0 %v3411_v32  ;;  %3032 = vmatprep.subr.bf16.mxu1 %v3411_v32 }
 0x982   : > { %3008 = vmatpush3.bf16.msra.mxu0 %v3411_v32  ;;  %3040 = vmatpush3.bf16.msra.mxu1 %v3411_v32 }
 0x985   : > { %3010 = vmatmul.mubr.bf16.vlgmr.msra.gmra.mxu0 %v2366_v41  ;;  %3014 = vmatmul.mubr.bf16.vlgmr.msra.gmra.mxu1 %v2368_v42 }
 0xa45   : > { %v3011_v44 = vpop.f32.mrf.mxu0  ;;  %v3015_v45 = vpop.f32.mrf.mxu1 }
 0xa46   : > { %v2483_v46 = vadd.f32 %v3011_v44, %v2937_v43  ;;  %v2499_v7 = vadd.f32 %v3015_v45, %v2937_v43 }
 0xa47   : > { %v2474_v8 = vpop.f32.mrf.mxu0  ;;  %v2490_v18 = vpop.f32.mrf.mxu1 }
 0xa48   : > { %2507 = vst [vmem:[#allocation19 + $0x10] sm:$0xff] %v2483_v46  ;;  %2511 = vst [vmem:[#allocation19 + $0x30] sm:$0xff] %v2499_v7  ;;  %v2475_v19 = vadd.f32 %v2937_v43, %v2474_v8  ;;  %v2491_v20 = vadd.f32 %v2937_v43, %v2490_v18 }
 0xa49   : > { %v3012_v21 = vpop.f32.mrf.mxu0  ;;  %v3016_v22 = vpop.f32.mrf.mxu1 }
 0xa4a   : > { %2505 = vst [vmem:[#allocation19] sm:$0xff] %v2475_v19  ;;  %2509 = vst [vmem:[#allocation19 + $0x20] sm:$0xff] %v2491_v20  ;;  %v2486_v23 = vadd.f32 %v3012_v21, %v2937_v43  ;;  %v2502_v59 = vadd.f32 %v3016_v22, %v2937_v43 }
 0xa4b   : > { %v2477_v52 = vpop.f32.mrf.mxu0  ;;  %v2493_v51 = vpop.f32.mrf.mxu1 }
 0xa4c   : > { %2508 = vst [vmem:[#allocation19 + $0x18] sm:$0xff] %v2486_v23  ;;  %2512 = vst [vmem:[#allocation19 + $0x38] sm:$0xff] %v2502_v59  ;;  %v2478_v56 = vadd.f32 %v2937_v43, %v2477_v52  ;;  %v2494_v57 = vadd.f32 %v2937_v43, %v2493_v51 }
 0xa4e   : > { %2506 = vst [vmem:[#allocation19 + $0x8] sm:$0xff] %v2478_v56  ;;  %2510 = vst [vmem:[#allocation19 + $0x28] sm:$0xff] %v2494_v57 }
 0xa4f PF: > { %s4981_s15 = sld [smem:[#allocation33_spill]]  ;;  %s2549_s18 = sshll.u32 %s661_s11, 4  ;;  %s2550_s18 = int_to_ptr.vmem [resolvable:$true] %s2549_s18 }
 0xa50   : > { %s4983_s24 = sld [smem:[#allocation63_spill]]  ;;  %s2514_s26 = scalar_lea.sflag [#allocation21], %s4132_s30 }
 0xa51   : > { %s3654_s17 = scalar_lea.vmem %s2550_s18, 128  ;;  %s3828_s16 = smov [#allocation20]  }
 0xa52   : > { %p3655_p1 = scmp.ne.s32.totalorder %s2550_s18, %s3654_s17  ;;  %s3658_s6 = sshll.u32 %s3828_s16, 4  ;;  %s3659_s6 = int_to_ptr.vmem [resolvable:$false] %s3658_s6 }
 0xa53   : > { %s3660_s14 = scalar_lea.vmem %s3659_s6, 256  ;;  %p3661_p6 = scmp.lt.s32.totalorder %s2550_s18, %s3659_s6 }
 0xa54   : > { %p3656_p2 = pnand %p3655_p1, %p4007_p10  ;;  %p3662_p12 = scmp.lt.s32.totalorder %s3660_s14, %s3654_s17 }
 0xa55   : > { %s2949_s10 = sshll.u32 %s4981_s15, 7 }
 0xa56   : > { %s4984_s20 = smov %s4983_s24  ;;  %s2547_s21 = scalar_lea.hbm %s4983_s24, %s2949_s10 }
 0xa57   : > { %p3657_p11 = pneg %p3656_p2  ;;  %p3663_p0 = por %p3662_p12, %p3661_p6 }
 0xa59   : > { %p3664_p4 = pnand %p3663_p0, %p3657_p11 }
 0xa5b   : > { %3667 = shalt.err (!%p3664_p4)
}
 0xa5c   : > { %s3668_s19 = scalar_lea.hbm %s2547_s21, 128  ;;  %s3672_s3 = scalar_lea.hbm %s4984_s20, 256 }
 0xa5d   : > { %p3669_p3 = scmp.ne.s32.totalorder %s2547_s21, %s3668_s19  ;;  %p3673_p5 = scmp.lt.s32.totalorder %s2547_s21, %s4984_s20 }
 0xa5e   : > { %p3674_p8 = scmp.lt.s32.totalorder %s3672_s3, %s3668_s19 }
 0xa5f   : > { %p3670_p7 = pnand %p3669_p3, %p4007_p10 }
 0xa60   : > { %p3675_p13 = por %p3674_p8, %p3673_p5 }
 0xa61   : > { %p3671_p9 = pneg %p3670_p7 }
 0xa63   : > { %p3676_p1 = pnand %p3675_p13, %p3671_p9 }
 0xa65   : > { %3679 = shalt.err (!%p3676_p1)
}
 0xa66   : > { %3071 = dma.vmem_to_hbm [thread:$0]  (%p4007_p10), %s2550_s18, 128, %s2547_s21, %s2514_s26  }
 0xa67   : > { %s3829_s12 = smov [#allocation19]   ;;  %s4985_s16 = sld [smem:[#allocation64_spill]] }
 0xa68   : > { %s2532_s9 = sshll.u32 %s3829_s12, 4  ;;  %p4986_p11 = scmp.eq.s32.totalorder %s3929_s27, 1  ;;  %s2533_s9 = int_to_ptr.vmem [resolvable:$true] %s2532_s9 }
 0xa69   : > { %s3680_s14 = scalar_lea.vmem %s2533_s9, 1024  ;;  %p3687_p0 = scmp.lt.s32.totalorder %s2533_s9, %s2533_s9 }
 0xa6a   : > { %p3681_p2 = scmp.ne.s32.totalorder %s2533_s9, %s3680_s14  ;;  %p3688_p4 = scmp.lt.s32.totalorder %s3680_s14, %s3680_s14 }
 0xa6c   : > { %p3682_p6 = pnand %p3681_p2, %p4986_p11  ;;  %p3689_p3 = por %p3688_p4, %p3687_p0 }
 0xa6d   : > { %s4814_s6 = scalar_lea.hbm %s4985_s16, %s2949_s10 }
 0xa6e   : > { %p3683_p12 = pneg %p3682_p6 }
 0xa70   : > { %p3690_p7 = pnand %p3689_p3, %p3683_p12 }
 0xa72   : > { %3693 = shalt.err (!%p3690_p7)
}
 0xa73   : > { %s3830_s21 = smov 128   ;;  %s3831_s15 = smov 8  }
 0xa74   : > { %p4987_p9 = pmov %p4986_p11  ;;  %s4988_s10 = sld [smem:[#allocation62_spill]] }
 0xa75   : > { %s2563_s0 = sshll.u32 %s668_s1, 4  ;;  %s3832_s3 = smov [#allocation22]   ;;  %s2564_s0 = int_to_ptr.vmem [resolvable:$true] %s2563_s0 }
 0xa76   : > { %s3704_s13 = scalar_lea.vmem %s2564_s0, 128  ;;  %s3708_s11 = sshll.u32 %s3832_s3, 4  ;;  %s3709_s11 = int_to_ptr.vmem [resolvable:$false] %s3708_s11 }
 0xa77   : > { %p3705_p5 = scmp.ne.s32.totalorder %s2564_s0, %s3704_s13  ;;  %s3710_s29 = scalar_lea.vmem %s3709_s11, 256 }
 0xa78   : > { %p3711_p1 = scmp.lt.s32.totalorder %s2564_s0, %s3709_s11  ;;  %p3712_p2 = scmp.lt.s32.totalorder %s3710_s29, %s3704_s13 }
 0xa79   : > { %p3706_p8 = pnand %p3705_p5, %p4007_p10 }
 0xa7a   : > { %3070 = dma.vmem_to_hbm [thread:$0]  (%p4987_p9), %s2533_s9, 1024, %s4988_s10, [#allocation6], %s3830_s21, %s3830_s21, %s3831_s15  }
 0xa7b   : > { %p3707_p13 = pneg %p3706_p8  ;;  %p3713_p11 = por %p3712_p2, %p3711_p1 }
 0xa7d   : > { %p3714_p6 = pnand %p3713_p11, %p3707_p13 }
 0xa7f   : > { %3717 = shalt.err (!%p3714_p6)
}
 0xa80   : > { %s3718_s23 = scalar_lea.hbm %s4814_s6, 128  ;;  %s3722_s9 = scalar_lea.hbm %s4985_s16, 256 }
 0xa81   : > { %p3719_p12 = scmp.ne.s32.totalorder %s4814_s6, %s3718_s23  ;;  %p3723_p3 = scmp.lt.s32.totalorder %s4814_s6, %s4985_s16 }
 0xa82   : > { %p3724_p7 = scmp.lt.s32.totalorder %s3722_s9, %s3718_s23 }
 0xa83   : > { %p3720_p0 = pnand %p3719_p12, %p4007_p10 }
 0xa84   : > { %p3725_p9 = por %p3724_p7, %p3723_p3 }
 0xa85   : > { %p3721_p4 = pneg %p3720_p0 }
 0xa87   : > { %p3726_p5 = pnand %p3725_p9, %p3721_p4 }
 0xa89   : > { %3729 = shalt.err (!%p3726_p5)
}
 0xa8a   : > { %3072 = dma.vmem_to_hbm [thread:$0]  (%p4007_p10), %s2564_s0, 128, %s4814_s6, %s2514_s26  }
 0xa8b   : > { %p4989_p8 = scmp.eq.s32.totalorder %s3929_s27, 1 }
 0xa8d   : > { %3783 = dma.done.wait (%p4989_p8), [#allocation6], 1024   ;;  %p4990_p13 = pmov %p4989_p8 }
 0xa8f   : > { %3785 = vsyncadd (%p4990_p13), [#allocation6], 4294966272 }
 0xa90 PF: > { %s4991_s14 = sld [smem:[#allocation34_spill]] }
 0xa91   : > { %s4993_s15 = sld [smem:[#allocation38_spill]] }
 0xa96   : > { %s4992_s21 = sadd.s32 4294967294, %s4991_s14   ;;  %p4995_p2 = scmp.ge.s32.totalorder %s4991_s14, 2 }
 0xa97   : > { %s2579_s18 = sand.u32 1, %s4992_s21   ;;  %p4994_p1 = scmp.ne.s32.totalorder %s4993_s15, 0 }
 0xa98   : > { %s2580_s28 = scalar_lea.sflag [#allocation21], %s2579_s18 }
 0xa99   : > { %p3107_p11 = pnand %p4995_p2, %p4994_p1 }
 0xa9b   : > { %p3108_p6 = pneg %p3107_p11 }
 0xa9d   : > { %3787 = dma.done.wait (%p3108_p6), %s2580_s28, 256  }
 0xa9e   : > { %3789 = vsyncadd (%p3108_p6), %s2580_s28, 4294967040  ;;  %s36_s26 = sadd.s32 1, %s4991_s14   ;;  %s4996_s30 = sld [smem:[#allocation32_spill]] }
 0xa9f   : > { %p33_p10 = scmp.ge.s32.totalorder %s36_s26, 4   ;;  %s4997_s23 = sld [smem:[#allocation37_spill]] }
 0xaa0   : > { %s4998_s27 = sld [smem:[#allocation35_spill]]  ;;  %s4999_s21 = smov %s3796_s22 }
 0xaa1   : > { %s5001_s24 = smov %s3808_s25 }
 0xaa2   :  { %35 = sbr.rel (!%p33_p10) target bundleno = 21 (0x15), region = 213 }
 0xaa4   : > { %s5000_s22 = smov %s4996_s30 }
 0xaa6   : > { %s5002_s25 = smov %s4998_s27 }
 0xaa7   :  { %2594 = vsyncpa [#allocation5], 1 }
 0xaa8   :  { %2596 = vsyncpa [#allocation5 + $0x1], 1 }
 0xaa9   :  { %2597 = vsyncpa [#allocation8], 1 }
 0xaaa   :  { %2598 = vsyncpa [#allocation11], 1 }
 0xaab   :  { %2600 = vsyncpa [#allocation11 + $0x1], 1 }
 0xaac   :  { %2601 = vsyncpa [#allocation14], 1 }
 0xaad   :  { %2603 = vsyncpa [#allocation14 + $0x1], 1 }
 0xaae   :  { %2604 = vsyncpa [#allocation17], 1 }
 0xaaf   :  { %2605 = vsyncpa [#allocation6], 1 }
 0xab0   :  { %2607 = vsyncpa [#allocation6 + $0x1], 1 }
 0xab1   :  { %2608 = vsyncpa [#allocation21], 1 }
 0xab2   :  { %2610 = vsyncpa [#allocation21 + $0x1], 1 }

</bundles_post_ra>
